<compile_context>
chip_gen: v7x
topology: tpu7x:2x2x1
jax: 0.10.0
libtpu: 0.0.40
codegen_flags: <defaults>
</compile_context>

<pallas_src>
import functools

import jax
import jax.numpy as jnp
from jax.experimental import pallas as pl
from jax.experimental.pallas import tpu as pltpu


ACT_DTYPE = jnp.bfloat16     # MXU operand dtype for activations & matmul weights

# Works on both newer (CompilerParams) and older (TPUCompilerParams) JAX.
_CompilerParams = getattr(pltpu, "CompilerParams", None) or getattr(
    pltpu, "TPUCompilerParams")


@functools.lru_cache(maxsize=None)
def _vmem_limit_bytes():
    """Generation-aware VMEM budget: ~70% of physical, capped, 32 MiB fallback."""
    default = 32 * 1024 * 1024
    get_info = getattr(pltpu, "get_tpu_info", None)
    if get_info is None:
        return default
    try:
        cap = int(getattr(get_info(), "vmem_capacity_bytes", 0) or 0)
    except Exception:
        return default
    if cap <= 0:
        return default
    # v7x: 64 MiB physical -> ~45 MiB; v5e/v6e: 128 MiB -> ~90 MiB.
    return min(int(cap * 0.70), 96 * 1024 * 1024)


def _cparams(dimension_semantics):
    return _CompilerParams(
        dimension_semantics=dimension_semantics,
        vmem_limit_bytes=_vmem_limit_bytes(),
    )


def _pick_tile(dim, pref, granules):
    """Largest divisor of `dim` <= pref that is a multiple of one of `granules`
    (tried in order); falls back to the full dim."""
    if dim <= pref:
        return dim
    for g in granules:
        t = (pref // g) * g
        while t >= g:
            if dim % t == 0:
                return t
            t -= g
    return dim


def _row_tile(m):
    # Big M tiles (>=0.5-1us of MXU work per step on v6e/v7x) but keep >=2
    # blocks when possible so both v7x TensorCores get work on the parallel axis.
    return _pick_tile(m, min(512, max(8, m // 2)), (8,))


def _pad_rows(x, multiple=8):
    """Pad the leading (row) dim to a multiple so _pick_tile never falls back to
    one huge block on a ragged M; padded rows are sliced off by the caller."""
    pad = (-x.shape[0]) % multiple
    if pad:
        x = jnp.pad(x, ((0, pad),) + ((0, 0),) * (x.ndim - 1))
    return x


# -----------------------------------------------------------------------------
# Dense (+ optional GELU) kernel
# -----------------------------------------------------------------------------
def _dense_kernel(x_ref, w_ref, b_ref, o_ref, *, act):
    # bf16 operands -> f32 MXU accumulation; epilogue in f32 on the VPU/EUP.
    y = jnp.dot(x_ref[...], w_ref[...], preferred_element_type=jnp.float32)
    y = y + b_ref[...].astype(jnp.float32)
    if act == "gelu":
        # TODO(synk): HF BERT uses exact erf-GELU; tanh-approx GELU (EUP) here.
        y = jax.nn.gelu(y, approximate=True)
    o_ref[...] = y.astype(o_ref.dtype)


def pallas_dense(x, w, b, act=None, out_dtype=None):
    """y = act(x @ w + b).  x:[M,K] w:[K,N] b:[N] -> [M,N]."""
    M0, K = x.shape
    _, N = w.shape
    out_dtype = out_dtype or x.dtype
    x = _pad_rows(x)
    M = x.shape[0]
    tm = _row_tile(M)
    tn = _pick_tile(N, 768, (256, 128))   # 256-multiple N tiles for 2x256x256 MXU
    # Grid order (N-tile outer, M-tile inner): the weight block index is constant
    # along the inner axis, so weights stay VMEM-resident while activations stream.
    grid = (N // tn, M // tm)
    # TODO(synk): at real LaBSE sizes (K up to 3072) optionally add a K-reduction
    # grid axis ("arbitrary") with a VMEM f32 accumulator scratch.
    out = pl.pallas_call(
        functools.partial(_dense_kernel, act=act),
        out_shape=jax.ShapeDtypeStruct((M, N), out_dtype),
        grid=grid,
        in_specs=[
            pl.BlockSpec((tm, K), lambda j, i: (i, 0)),
            pl.BlockSpec((K, tn), lambda j, i: (0, j)),
            pl.BlockSpec((1, tn), lambda j, i: (0, j)),
        ],
        out_specs=pl.BlockSpec((tm, tn), lambda j, i: (i, j)),
        compiler_params=_cparams(("parallel", "parallel")),
    )(x, w, b.reshape(1, N))
    return out[:M0] if M != M0 else out


# -----------------------------------------------------------------------------
# Dense fused with residual add + LayerNorm epilogue
# -----------------------------------------------------------------------------
def _dense_res_ln_kernel(x_ref, w_ref, b_ref, r_ref, g_ref, lb_ref, o_ref, *, eps):
    # Fused:   LayerNorm( residual + (x @ w + b) )
    y = jnp.dot(x_ref[...], w_ref[...], preferred_element_type=jnp.float32)
    y = y + b_ref[...].astype(jnp.float32) + r_ref[...].astype(jnp.float32)
    mean = jnp.mean(y, axis=-1, keepdims=True)
    c = y - mean
    var = jnp.mean(c * c, axis=-1, keepdims=True)
    z = c * jax.lax.rsqrt(var + eps)
    o_ref[...] = (z * g_ref[...] + lb_ref[...]).astype(o_ref.dtype)


def pallas_dense_res_ln(x, w, b, res, g, lb, eps=1e-12, out_dtype=None):
    """LayerNorm(res + x @ w + b).  x:[M,K] w:[K,H] res:[M,H] -> [M,H]."""
    M0, K = x.shape
    _, N = w.shape
    out_dtype = out_dtype or res.dtype
    x = _pad_rows(x)
    res = _pad_rows(res)
    M = x.shape[0]
    tm = _row_tile(M)
    grid = (M // tm,)
    # Weight / bias / gamma / beta blocks have constant index (0,0): fetched once,
    # resident across the whole M grid.
    # TODO(synk): on v7x, single-buffer these constant blocks with
    # pipeline_mode=pl.Buffered(1) to reclaim VMEM headroom (64 MiB physical).
    out = pl.pallas_call(
        functools.partial(_dense_res_ln_kernel, eps=eps),
        out_shape=jax.ShapeDtypeStruct((M, N), out_dtype),
        grid=grid,
        in_specs=[
            pl.BlockSpec((tm, K), lambda i: (i, 0)),
            pl.BlockSpec((K, N), lambda i: (0, 0)),
            pl.BlockSpec((1, N), lambda i: (0, 0)),
            pl.BlockSpec((tm, N), lambda i: (i, 0)),
            pl.BlockSpec((1, N), lambda i: (0, 0)),
            pl.BlockSpec((1, N), lambda i: (0, 0)),
        ],
        out_specs=pl.BlockSpec((tm, N), lambda i: (i, 0)),
        compiler_params=_cparams(("parallel",)),
    )(x, w, b.reshape(1, N), res, g.reshape(1, N), lb.reshape(1, N))
    return out[:M0] if M != M0 else out


# -----------------------------------------------------------------------------
# Standalone LayerNorm (embeddings)
# -----------------------------------------------------------------------------
def _layernorm_kernel(x_ref, g_ref, b_ref, o_ref, *, eps):
    x = x_ref[...].astype(jnp.float32)
    mean = jnp.mean(x, axis=-1, keepdims=True)
    c = x - mean
    var = jnp.mean(c * c, axis=-1, keepdims=True)
    y = c * jax.lax.rsqrt(var + eps)
    o_ref[...] = (y * g_ref[...] + b_ref[...]).astype(o_ref.dtype)


def pallas_layernorm(x, g, b, eps=1e-12, out_dtype=None):
    """LayerNorm over the last dim. x:[M,H], g,b:[H]."""
    M0, H = x.shape
    out_dtype = out_dtype or x.dtype
    x = _pad_rows(x)
    M = x.shape[0]
    tm = _row_tile(M)
    grid = (M // tm,)
    out = pl.pallas_call(
        functools.partial(_layernorm_kernel, eps=eps),
        out_shape=jax.ShapeDtypeStruct((M, H), out_dtype),
        grid=grid,
        in_specs=[
            pl.BlockSpec((tm, H), lambda i: (i, 0)),
            pl.BlockSpec((1, H), lambda i: (0, 0)),
            pl.BlockSpec((1, H), lambda i: (0, 0)),
        ],
        out_specs=pl.BlockSpec((tm, H), lambda i: (i, 0)),
        compiler_params=_cparams(("parallel",)),
    )(x, g.reshape(1, H), b.reshape(1, H))
    return out[:M0] if M != M0 else out


# -----------------------------------------------------------------------------
# Attention: all heads of one batch item per grid step, flash tiling over KV.
# Reads Q/K/V straight out of the fused [B,S,3,nH,Dh] buffer (no transposes),
# writes the output in merged-head [B,S,H] layout (lane-dense stores).
# -----------------------------------------------------------------------------
def _attention_kernel(bias_ref, q_ref, k_ref, v_ref, o_ref,
                      m_sc, l_sc, acc_sc, *, num_heads, head_dim):
    kv = pl.program_id(1)

    @pl.when(kv == 0)
    def _init():
        m_sc[...] = jnp.full_like(m_sc, -jnp.inf)
        l_sc[...] = jnp.zeros_like(l_sc)
        acc_sc[...] = jnp.zeros_like(acc_sc)

    bias = bias_ref[...].astype(jnp.float32)               # [1, tk] additive mask
    for h in range(num_heads):
        qh = q_ref[:, h, :]                                # [S,  Dh] bf16 (pre-scaled)
        kh = k_ref[:, h, :]                                # [tk, Dh] bf16
        vh = v_ref[:, h, :]                                # [tk, Dh] bf16
        s = jax.lax.dot_general(qh, kh, (((1,), (1,)), ((), ())),
                                preferred_element_type=jnp.float32)   # [S, tk]
        s = s + bias                                        # broadcast over rows
        m_prev = m_sc[:, h:h + 1]                           # [S, 1]
        m_new = jnp.maximum(m_prev, jnp.max(s, axis=-1, keepdims=True))
        a = jnp.exp(m_prev - m_new)
        p = jnp.exp(s - m_new)
        l_sc[:, h:h + 1] = a * l_sc[:, h:h + 1] + jnp.sum(p, axis=-1, keepdims=True)
        sl = slice(h * head_dim, (h + 1) * head_dim)
        acc_sc[:, sl] = a * acc_sc[:, sl] + jnp.dot(
            p.astype(vh.dtype), vh, preferred_element_type=jnp.float32)
        m_sc[:, h:h + 1] = m_new

    @pl.when(kv == pl.num_programs(1) - 1)
    def _finalize():
        for h in range(num_heads):
            sl = slice(h * head_dim, (h + 1) * head_dim)
            inv_l = pl.reciprocal(l_sc[:, h:h + 1], approx=True)
            o_ref[:, sl] = (acc_sc[:, sl] * inv_l).astype(o_ref.dtype)


def pallas_attention(qkv, mask_bias):
    """qkv: [B, S, 3, nH, Dh] (Q pre-scaled by 1/sqrt(Dh)), mask_bias: [B,1,S] f32.
    Returns context in merged-head layout [B, S, nH*Dh]."""
    B, S, _, nH, Dh = qkv.shape
    H = nH * Dh
    tk = _pick_tile(S, 256, (128, 8))     # flash KV tile; full S when S <= 256
    n_kv = S // tk

    q_spec = pl.BlockSpec((None, S, None, nH, Dh), lambda b, kv: (b, 0, 0, 0, 0))
    k_spec = pl.BlockSpec((None, tk, None, nH, Dh), lambda b, kv: (b, kv, 1, 0, 0))
    v_spec = pl.BlockSpec((None, tk, None, nH, Dh), lambda b, kv: (b, kv, 2, 0, 0))

    return pl.pallas_call(
        functools.partial(_attention_kernel, num_heads=nH, head_dim=Dh),
        out_shape=jax.ShapeDtypeStruct((B, S, H), qkv.dtype),
        grid=(B, n_kv),
        in_specs=[
            pl.BlockSpec((None, 1, tk), lambda b, kv: (b, 0, kv)),
            q_spec, k_spec, v_spec,
        ],
        out_specs=pl.BlockSpec((None, S, H), lambda b, kv: (b, 0, 0)),
        scratch_shapes=[
            pltpu.VMEM((S, nH), jnp.float32),    # running max per (row, head)
            pltpu.VMEM((S, nH), jnp.float32),    # running denom per (row, head)
            pltpu.VMEM((S, H), jnp.float32),     # f32 output accumulator
        ],
        compiler_params=_cparams(("parallel", "arbitrary")),
    )(mask_bias, qkv, qkv, qkv)


# -----------------------------------------------------------------------------
# Model (glue in plain JAX, hot path in Pallas kernels above)
# -----------------------------------------------------------------------------
CFG = dict(
    vocab_size=100,
    hidden=32,
    heads=2,
    layers=2,
    intermediate=64,
    max_pos=16,
    type_vocab=2,
)


def init_params(key, cfg):
    H, I, nH = cfg["hidden"], cfg["intermediate"], cfg["heads"]
    Dh = H // nH

    def nrm(k, shape):
        return jax.random.normal(k, shape, jnp.float32) * 0.02

    keys = iter(jax.random.split(key, 8 + cfg["layers"] * 8))
    params = {
        "word_emb": nrm(next(keys), (cfg["vocab_size"], H)),
        "pos_emb": nrm(next(keys), (cfg["max_pos"], H)),
        "type_emb": nrm(next(keys), (cfg["type_vocab"], H)),
        "emb_ln_g": jnp.ones((H,), jnp.float32),
        "emb_ln_b": jnp.zeros((H,), jnp.float32),
        "pool_w": nrm(next(keys), (H, H)),
        "pool_b": jnp.zeros((H,), jnp.float32),
        "layers": [],
    }
    scale = float(Dh) ** -0.5
    for _ in range(cfg["layers"]):
        # Fused Q|K|V projection; fold 1/sqrt(Dh) into the Q slice so the
        # attention kernel needs no [S,S] VPU multiply (biggest win on v5e).
        wqkv = nrm(next(keys), (H, 3 * H)).at[:, :H].multiply(scale)
        bqkv = jnp.zeros((3 * H,), jnp.float32).at[:H].multiply(scale)
        layer = {
            "wqkv": wqkv.astype(ACT_DTYPE),
            "bqkv": bqkv,
            "wo": nrm(next(keys), (H, H)).astype(ACT_DTYPE),
            "bo": jnp.zeros((H,), jnp.float32),
            "ln1_g": jnp.ones((H,), jnp.float32),
            "ln1_b": jnp.zeros((H,), jnp.float32),
            "w1": nrm(next(keys), (H, I)).astype(ACT_DTYPE),
            "b1": jnp.zeros((I,), jnp.float32),
            "w2": nrm(next(keys), (I, H)).astype(ACT_DTYPE),
            "b2": jnp.zeros((H,), jnp.float32),
            "ln2_g": jnp.ones((H,), jnp.float32),
            "ln2_b": jnp.zeros((H,), jnp.float32),
        }
        params["layers"].append(layer)
    return params


def custom_labse_forward(params, input_ids, attention_mask=None,
                         token_type_ids=None):
    """Equivalent of CustomLabseModel.forward(...) -> pooler_output."""
    cfg = CFG
    B, S = input_ids.shape
    H, nH = cfg["hidden"], cfg["heads"]
    Dh = H // nH
    M = B * S

    if attention_mask is None:
        attention_mask = jnp.ones((B, S), jnp.int32)
    if token_type_ids is None:
        token_type_ids = jnp.zeros((B, S), jnp.int32)

    # Additive mask bias computed ONCE in the wrapper (tiny [B,1,S]); never a
    # dense [B*nH, S, S] tensor, never recomputed per (batch, head) in-kernel.
    mask_bias = (1.0 - attention_mask.astype(jnp.float32)).reshape(B, 1, S) * -1e9

    # ---- embeddings (gathers = XLA glue) + LayerNorm (Pallas) --------------
    x = (params["word_emb"][input_ids]
         + params["pos_emb"][:S][None, :, :]
         + params["type_emb"][token_type_ids])
    # TODO(synk): residual stream is carried in bf16 between layers (HF keeps
    # f32 hidden states); acceptable drift for this synthetic-weight model.
    x = pallas_layernorm(x.reshape(M, H), params["emb_ln_g"],
                         params["emb_ln_b"], out_dtype=ACT_DTYPE)

    # ---- transformer encoder layers ----------------------------------------
    for layer in params["layers"]:
        # Fused QKV projection: one x read, one matmul with N = 3H.
        qkv = pallas_dense(x, layer["wqkv"], layer["bqkv"])          # [M, 3H]
        # Contiguous reshape only (no transpose): [M,3H] -> [B,S,3,nH,Dh].
        qkv5 = qkv.reshape(B, S, 3, nH, Dh)
        # Attention output comes back already in merged-head [B,S,H] layout.
        ctx = pallas_attention(qkv5, mask_bias).reshape(M, H)

        # Attention output projection fused with residual add + LayerNorm.
        x = pallas_dense_res_ln(ctx, layer["wo"], layer["bo"],
                                x, layer["ln1_g"], layer["ln1_b"])

        # FFN: up-projection + GELU, then down-projection fused with res + LN.
        ff = pallas_dense(x, layer["w1"], layer["b1"], act="gelu")   # [M, I]
        x = pallas_dense_res_ln(ff, layer["w2"], layer["b2"],
                                x, layer["ln2_g"], layer["ln2_b"])

    # ---- pooler: tanh(W @ hidden[:, 0] + b) --------------------------------
    # Left to XLA: [B,H] x [H,H] is launch-overhead-bound as a pallas_call with
    # masked sub-(8,128) stores.
    cls = x.reshape(B, S, H)[:, 0, :].astype(jnp.float32)            # [B, H]
    pooler_output = jnp.tanh(cls @ params["pool_w"] + params["pool_b"])
    return pooler_output


# -----------------------------------------------------------------------------
if __name__ == "__main__":
    key = jax.random.PRNGKey(0)
    pkey, ikey = jax.random.split(key)

    params = init_params(pkey, CFG)

    B, S = 2, 8
    input_ids = jax.random.randint(ikey, (B, S), 0, CFG["vocab_size"],
                                   dtype=jnp.int32)
    attention_mask = jnp.ones((B, S), jnp.int32).at[1, 6:].set(0)  # ragged mask

    fwd = jax.jit(custom_labse_forward)
    pooled = fwd(params, input_ids, attention_mask)
    jax.block_until_ready(pooled)

    assert pooled.shape == (B, CFG["hidden"])
    assert bool(jnp.all(jnp.isfinite(pooled)))
    print("KERNEL_OK")
</pallas_src>

<mosaic_0001>
module attributes {stable_mosaic.version = 11 : i64} {
  func.func @_dense_kernel(%arg0: i32, %arg1: i32, %arg2: memref<8x32xbf16, #tpu.memory_space<vmem>>, %arg3: memref<32x96xbf16, #tpu.memory_space<vmem>>, %arg4: memref<1x96xf32, #tpu.memory_space<vmem>>, %arg5: memref<8x96xbf16, #tpu.memory_space<vmem>>) attributes {dimension_semantics = [#tpu.dimension_semantics<parallel>, #tpu.dimension_semantics<parallel>], iteration_bounds = array<i64: 1, 2>, scalar_prefetch = 0 : i64, scratch_operands = 0 : i64, tpu.core_type = #tpu.core_type<tc>, window_params = [{transform_indices = @transform_0, window_bounds = array<i64: 8, 32>}, {transform_indices = @transform_1, window_bounds = array<i64: 32, 96>}, {transform_indices = @transform_2, window_bounds = array<i64: 1, 96>}, {transform_indices = @transform_3, window_bounds = array<i64: 8, 96>}]} {
    %c0 = arith.constant 0 : index
    %c0_0 = arith.constant 0 : index
    %0 = vector.load %arg2[%c0, %c0_0] : memref<8x32xbf16, #tpu.memory_space<vmem>>, vector<8x32xbf16>
    %c0_1 = arith.constant 0 : index
    %c0_2 = arith.constant 0 : index
    %1 = vector.load %arg3[%c0_1, %c0_2] : memref<32x96xbf16, #tpu.memory_space<vmem>>, vector<32x96xbf16>
    %cst = arith.constant dense<0.000000e+00> : vector<8x96xf32>
    %2 = tpu.matmul %0, %1, %cst {dimension_numbers = #tpu.dot_dimension_numbers<[1], [0], [0], [1], [0, 0, 1, 1], [], []>} : vector<8x32xbf16>, vector<32x96xbf16>, vector<8x96xf32> -> vector<8x96xf32>
    %c0_3 = arith.constant 0 : index
    %c0_4 = arith.constant 0 : index
    %3 = vector.load %arg4[%c0_3, %c0_4] : memref<1x96xf32, #tpu.memory_space<vmem>>, vector<1x96xf32>
    %4 = vector.broadcast %3 : vector<1x96xf32> to vector<8x96xf32>
    %5 = arith.addf %2, %4 : vector<8x96xf32>
    %6 = arith.truncf %5 : vector<8x96xf32> to vector<8x96xbf16>
    %c0_5 = arith.constant 0 : index
    %c0_6 = arith.constant 0 : index
    %7 = vector.load %arg5[%c0_5, %c0_6] : memref<8x96xbf16, #tpu.memory_space<vmem>>, vector<8x96xbf16>
    tpu.vector_store %arg5[%c0_5, %c0_6], %6 {strides = array<i32>} : memref<8x96xbf16, #tpu.memory_space<vmem>>, vector<8x96xbf16>,
    return
  }
  func.func @transform_0(%arg0: i32, %arg1: i32) -> (i32, i32) {
    %c0_i32 = arith.constant 0 : i32
    %c0_i32_0 = arith.constant 0 : i32
    return %arg1, %c0_i32 : i32, i32
  }
  func.func @transform_1(%arg0: i32, %arg1: i32) -> (i32, i32) {
    %c0_i32 = arith.constant 0 : i32
    %c0_i32_0 = arith.constant 0 : i32
    return %c0_i32, %arg0 : i32, i32
  }
  func.func @transform_2(%arg0: i32, %arg1: i32) -> (i32, i32) {
    %c0_i32 = arith.constant 0 : i32
    %c0_i32_0 = arith.constant 0 : i32
    return %c0_i32, %arg0 : i32, i32
  }
  func.func @transform_3(%arg0: i32, %arg1: i32) -> (i32, i32) {
    %c0_i32 = arith.constant 0 : i32
    return %arg1, %arg0 : i32, i32
  }
}

module attributes {stable_mosaic.version = 11 : i64} {
  func.func @_layernorm_kernel(%arg0: i32, %arg1: memref<8x32xf32, #tpu.memory_space<vmem>>, %arg2: memref<1x32xf32, #tpu.memory_space<vmem>>, %arg3: memref<1x32xf32, #tpu.memory_space<vmem>>, %arg4: memref<8x32xbf16, #tpu.memory_space<vmem>>) attributes {dimension_semantics = [#tpu.dimension_semantics<parallel>], iteration_bounds = array<i64: 2>, scalar_prefetch = 0 : i64, scratch_operands = 0 : i64, tpu.core_type = #tpu.core_type<tc>, window_params = [{transform_indices = @transform_0, window_bounds = array<i64: 8, 32>}, {pipeline_mode = #tpu.pipeline_mode<synchronous>, transform_indices = @transform_1, window_bounds = array<i64: 1, 32>}, {pipeline_mode = #tpu.pipeline_mode<synchronous>, transform_indices = @transform_2, window_bounds = array<i64: 1, 32>}, {transform_indices = @transform_3, window_bounds = array<i64: 8, 32>}]} {
    %c0 = arith.constant 0 : index
    %c0_0 = arith.constant 0 : index
    %0 = vector.load %arg1[%c0, %c0_0] : memref<8x32xf32, #tpu.memory_space<vmem>>, vector<8x32xf32>
    %cst = arith.constant dense<0.000000e+00> : vector<8xf32>
    %1 = vector.multi_reduction <add>, %0, %cst [1] : vector<8x32xf32> to vector<8xf32>
    %2 = vector.shape_cast %1 : vector<8xf32> to vector<8x1xf32>
    %cst_1 = arith.constant 3.200000e+01 : f32
    %3 = vector.broadcast %cst_1 : f32 to vector<8x1xf32>
    %4 = arith.divf %2, %3 : vector<8x1xf32>
    %5 = vector.broadcast %4 : vector<8x1xf32> to vector<8x32xf32>
    %6 = arith.subf %0, %5 : vector<8x32xf32>
    %7 = arith.mulf %6, %6 : vector<8x32xf32>
    %cst_2 = arith.constant dense<0.000000e+00> : vector<8xf32>
    %8 = vector.multi_reduction <add>, %7, %cst_2 [1] : vector<8x32xf32> to vector<8xf32>
    %9 = vector.shape_cast %8 : vector<8xf32> to vector<8x1xf32>
    %cst_3 = arith.constant 3.200000e+01 : f32
    %10 = vector.broadcast %cst_3 : f32 to vector<8x1xf32>
    %11 = arith.divf %9, %10 : vector<8x1xf32>
    %cst_4 = arith.constant 9.99999996E-13 : f32
    %12 = vector.broadcast %cst_4 : f32 to vector<8x1xf32>
    %13 = arith.addf %11, %12 : vector<8x1xf32>
    %14 = math.rsqrt %13 : vector<8x1xf32>
    %15 = vector.broadcast %14 : vector<8x1xf32> to vector<8x32xf32>
    %16 = arith.mulf %6, %15 : vector<8x32xf32>
    %c0_5 = arith.constant 0 : index
    %c0_6 = arith.constant 0 : index
    %17 = vector.load %arg2[%c0_5, %c0_6] : memref<1x32xf32, #tpu.memory_space<vmem>>, vector<1x32xf32>
    %18 = vector.broadcast %17 : vector<1x32xf32> to vector<8x32xf32>
    %19 = arith.mulf %16, %18 : vector<8x32xf32>
    %c0_7 = arith.constant 0 : index
    %c0_8 = arith.constant 0 : index
    %20 = vector.load %arg3[%c0_7, %c0_8] : memref<1x32xf32, #tpu.memory_space<vmem>>, vector<1x32xf32>
    %21 = vector.broadcast %20 : vector<1x32xf32> to vector<8x32xf32>
    %22 = arith.addf %19, %21 : vector<8x32xf32>
    %23 = arith.truncf %22 : vector<8x32xf32> to vector<8x32xbf16>
    %c0_9 = arith.constant 0 : index
    %c0_10 = arith.constant 0 : index
    %24 = vector.load %arg4[%c0_9, %c0_10] : memref<8x32xbf16, #tpu.memory_space<vmem>>, vector<8x32xbf16>
    tpu.vector_store %arg4[%c0_9, %c0_10], %23 {strides = array<i32>} : memref<8x32xbf16, #tpu.memory_space<vmem>>, vector<8x32xbf16>,
    return
  }
  func.func @transform_0(%arg0: i32) -> (i32, i32) {
    %c0_i32 = arith.constant 0 : i32
    %c0_i32_0 = arith.constant 0 : i32
    return %arg0, %c0_i32 : i32, i32
  }
  func.func @transform_1(%arg0: i32) -> (i32, i32) {
    %c0_i32 = arith.constant 0 : i32
    %c0_i32_0 = arith.constant 0 : i32
    %c0_i32_1 = arith.constant 0 : i32
    return %c0_i32, %c0_i32_0 : i32, i32
  }
  func.func @transform_2(%arg0: i32) -> (i32, i32) {
    %c0_i32 = arith.constant 0 : i32
    %c0_i32_0 = arith.constant 0 : i32
    %c0_i32_1 = arith.constant 0 : i32
    return %c0_i32, %c0_i32_0 : i32, i32
  }
  func.func @transform_3(%arg0: i32) -> (i32, i32) {
    %c0_i32 = arith.constant 0 : i32
    %c0_i32_0 = arith.constant 0 : i32
    return %arg0, %c0_i32 : i32, i32
  }
}

module attributes {stable_mosaic.version = 11 : i64} {
  func.func @_attention_kernel(%arg0: i32, %arg1: i32, %arg2: memref<1x1x8xf32, #tpu.memory_space<vmem>>, %arg3: memref<1x8x1x2x16xbf16, #tpu.memory_space<vmem>>, %arg4: memref<1x8x1x2x16xbf16, #tpu.memory_space<vmem>>, %arg5: memref<1x8x1x2x16xbf16, #tpu.memory_space<vmem>>, %arg6: memref<1x8x32xbf16, #tpu.memory_space<vmem>>, %arg7: memref<8x2xf32, #tpu.memory_space<vmem>>, %arg8: memref<8x2xf32, #tpu.memory_space<vmem>>, %arg9: memref<8x32xf32, #tpu.memory_space<vmem>>) attributes {dimension_semantics = [#tpu.dimension_semantics<parallel>, #tpu.dimension_semantics<arbitrary>], iteration_bounds = array<i64: 2, 1>, scalar_prefetch = 0 : i64, scratch_operands = 3 : i64, tpu.core_type = #tpu.core_type<tc>, window_params = [{transform_indices = @transform_0, window_bounds = array<i64: 1, 1, 8>}, {transform_indices = @transform_1, window_bounds = array<i64: 1, 8, 1, 2, 16>}, {transform_indices = @transform_2, window_bounds = array<i64: 1, 8, 1, 2, 16>}, {transform_indices = @transform_3, window_bounds = array<i64: 1, 8, 1, 2, 16>}, {transform_indices = @transform_4, window_bounds = array<i64: 1, 8, 32>}]} {
    %c0_i32 = arith.constant 0 : i32
    %0 = arith.cmpi eq, %arg1, %c0_i32 : i32
    %1 = arith.extui %0 : i1 to i32
    %c0_i32_0 = arith.constant 0 : i32
    %2 = arith.cmpi ne, %1, %c0_i32_0 : i32
    scf.if %2 {
      %cst_64 = arith.constant 0xFF800000 : f32
      %72 = vector.broadcast %cst_64 : f32 to vector<8x2xf32>
      %c0_65 = arith.constant 0 : index
      %c0_66 = arith.constant 0 : index
      %73 = vector.load %arg7[%c0_65, %c0_66] : memref<8x2xf32, #tpu.memory_space<vmem>>, vector<8x2xf32>
      tpu.vector_store %arg7[%c0_65, %c0_66], %72 {strides = array<i32>} : memref<8x2xf32, #tpu.memory_space<vmem>>, vector<8x2xf32>,
      %cst_67 = arith.constant 0.000000e+00 : f32
      %74 = vector.broadcast %cst_67 : f32 to vector<8x2xf32>
      %c0_68 = arith.constant 0 : index
      %c0_69 = arith.constant 0 : index
      %75 = vector.load %arg8[%c0_68, %c0_69] : memref<8x2xf32, #tpu.memory_space<vmem>>, vector<8x2xf32>
      tpu.vector_store %arg8[%c0_68, %c0_69], %74 {strides = array<i32>} : memref<8x2xf32, #tpu.memory_space<vmem>>, vector<8x2xf32>,
      %cst_70 = arith.constant 0.000000e+00 : f32
      %76 = vector.broadcast %cst_70 : f32 to vector<8x32xf32>
      %c0_71 = arith.constant 0 : index
      %c0_72 = arith.constant 0 : index
      %77 = vector.load %arg9[%c0_71, %c0_72] : memref<8x32xf32, #tpu.memory_space<vmem>>, vector<8x32xf32>
      tpu.vector_store %arg9[%c0_71, %c0_72], %76 {strides = array<i32>} : memref<8x32xf32, #tpu.memory_space<vmem>>, vector<8x32xf32>,
    } else {
    }
    %c0 = arith.constant 0 : index
    %c0_1 = arith.constant 0 : index
    %c0_2 = arith.constant 0 : index
    %3 = vector.load %arg2[%c0, %c0_1, %c0_2] : memref<1x1x8xf32, #tpu.memory_space<vmem>>, vector<1x1x8xf32>
    %4 = vector.shape_cast %3 : vector<1x1x8xf32> to vector<1x8xf32>
    %c0_3 = arith.constant 0 : index
    %c0_4 = arith.constant 0 : index
    %c0_5 = arith.constant 0 : index
    %c0_6 = arith.constant 0 : index
    %c0_7 = arith.constant 0 : index
    %5 = vector.load %arg3[%c0_3, %c0_4, %c0_5, %c0_6, %c0_7] : memref<1x8x1x2x16xbf16, #tpu.memory_space<vmem>>, vector<1x8x1x1x16xbf16>
    %6 = vector.shape_cast %5 : vector<1x8x1x1x16xbf16> to vector<8x16xbf16>
    %c0_8 = arith.constant 0 : index
    %c0_9 = arith.constant 0 : index
    %c0_10 = arith.constant 0 : index
    %c0_11 = arith.constant 0 : index
    %c0_12 = arith.constant 0 : index
    %7 = vector.load %arg4[%c0_8, %c0_9, %c0_10, %c0_11, %c0_12] : memref<1x8x1x2x16xbf16, #tpu.memory_space<vmem>>, vector<1x8x1x1x16xbf16>
    %8 = vector.shape_cast %7 : vector<1x8x1x1x16xbf16> to vector<8x16xbf16>
    %c0_13 = arith.constant 0 : index
    %c0_14 = arith.constant 0 : index
    %c0_15 = arith.constant 0 : index
    %c0_16 = arith.constant 0 : index
    %c0_17 = arith.constant 0 : index
    %9 = vector.load %arg5[%c0_13, %c0_14, %c0_15, %c0_16, %c0_17] : memref<1x8x1x2x16xbf16, #tpu.memory_space<vmem>>, vector<1x8x1x1x16xbf16>
    %10 = vector.shape_cast %9 : vector<1x8x1x1x16xbf16> to vector<8x16xbf16>
    %cst = arith.constant dense<0.000000e+00> : vector<8x8xf32>
    %11 = tpu.matmul %6, %8, %cst {dimension_numbers = #tpu.dot_dimension_numbers<[1], [1], [0], [0], [0, 0, 1, 0], [], []>} : vector<8x16xbf16>, vector<8x16xbf16>, vector<8x8xf32> -> vector<8x8xf32>
    %12 = vector.broadcast %4 : vector<1x8xf32> to vector<8x8xf32>
    %13 = arith.addf %11, %12 : vector<8x8xf32>
    %c0_18 = arith.constant 0 : index
    %c0_19 = arith.constant 0 : index
    %14 = vector.load %arg7[%c0_18, %c0_19] : memref<8x2xf32, #tpu.memory_space<vmem>>, vector<8x1xf32>
    %cst_20 = arith.constant dense<0xFF800000> : vector<8xf32>
    %15 = vector.multi_reduction <maximumf>, %13, %cst_20 [1] : vector<8x8xf32> to vector<8xf32>
    %16 = vector.shape_cast %15 : vector<8xf32> to vector<8x1xf32>
    %17 = arith.maximumf %14, %16 : vector<8x1xf32>
    %18 = arith.subf %14, %17 : vector<8x1xf32>
    %19 = math.exp %18 : vector<8x1xf32>
    %20 = vector.broadcast %17 : vector<8x1xf32> to vector<8x8xf32>
    %21 = arith.subf %13, %20 : vector<8x8xf32>
    %22 = math.exp %21 : vector<8x8xf32>
    %c0_21 = arith.constant 0 : index
    %c0_22 = arith.constant 0 : index
    %23 = vector.load %arg8[%c0_21, %c0_22] : memref<8x2xf32, #tpu.memory_space<vmem>>, vector<8x1xf32>
    %24 = arith.mulf %19, %23 : vector<8x1xf32>
    %cst_23 = arith.constant dense<0.000000e+00> : vector<8xf32>
    %25 = vector.multi_reduction <add>, %22, %cst_23 [1] : vector<8x8xf32> to vector<8xf32>
    %26 = vector.shape_cast %25 : vector<8xf32> to vector<8x1xf32>
    %27 = arith.addf %24, %26 : vector<8x1xf32>
    %c0_24 = arith.constant 0 : index
    %c0_25 = arith.constant 0 : index
    %28 = vector.load %arg8[%c0_24, %c0_25] : memref<8x2xf32, #tpu.memory_space<vmem>>, vector<8x1xf32>
    tpu.vector_store %arg8[%c0_24, %c0_25], %27 {strides = array<i32>} : memref<8x2xf32, #tpu.memory_space<vmem>>, vector<8x1xf32>,
    %c0_26 = arith.constant 0 : index
    %c0_27 = arith.constant 0 : index
    %29 = vector.load %arg9[%c0_26, %c0_27] : memref<8x32xf32, #tpu.memory_space<vmem>>, vector<8x16xf32>
    %30 = vector.broadcast %19 : vector<8x1xf32> to vector<8x16xf32>
    %31 = arith.mulf %30, %29 : vector<8x16xf32>
    %32 = arith.truncf %22 : vector<8x8xf32> to vector<8x8xbf16>
    %cst_28 = arith.constant dense<0.000000e+00> : vector<8x16xf32>
    %33 = tpu.matmul %32, %10, %cst_28 {dimension_numbers = #tpu.dot_dimension_numbers<[1], [0], [0], [1], [0, 0, 1, 1], [], []>} : vector<8x8xbf16>, vector<8x16xbf16>, vector<8x16xf32> -> vector<8x16xf32>
    %34 = arith.addf %31, %33 : vector<8x16xf32>
    %c0_29 = arith.constant 0 : index
    %c0_30 = arith.constant 0 : index
    %35 = vector.load %arg9[%c0_29, %c0_30] : memref<8x32xf32, #tpu.memory_space<vmem>>, vector<8x16xf32>
    tpu.vector_store %arg9[%c0_29, %c0_30], %34 {strides = array<i32>} : memref<8x32xf32, #tpu.memory_space<vmem>>, vector<8x16xf32>,
    %c0_31 = arith.constant 0 : index
    %c0_32 = arith.constant 0 : index
    %36 = vector.load %arg7[%c0_31, %c0_32] : memref<8x2xf32, #tpu.memory_space<vmem>>, vector<8x1xf32>
    tpu.vector_store %arg7[%c0_31, %c0_32], %17 {strides = array<i32>} : memref<8x2xf32, #tpu.memory_space<vmem>>, vector<8x1xf32>,
    %c0_33 = arith.constant 0 : index
    %c0_34 = arith.constant 0 : index
    %c0_35 = arith.constant 0 : index
    %c1 = arith.constant 1 : index
    %c0_36 = arith.constant 0 : index
    %37 = vector.load %arg3[%c0_33, %c0_34, %c0_35, %c1, %c0_36] : memref<1x8x1x2x16xbf16, #tpu.memory_space<vmem>>, vector<1x8x1x1x16xbf16>
    %38 = vector.shape_cast %37 : vector<1x8x1x1x16xbf16> to vector<8x16xbf16>
    %c0_37 = arith.constant 0 : index
    %c0_38 = arith.constant 0 : index
    %c0_39 = arith.constant 0 : index
    %c1_40 = arith.constant 1 : index
    %c0_41 = arith.constant 0 : index
    %39 = vector.load %arg4[%c0_37, %c0_38, %c0_39, %c1_40, %c0_41] : memref<1x8x1x2x16xbf16, #tpu.memory_space<vmem>>, vector<1x8x1x1x16xbf16>
    %40 = vector.shape_cast %39 : vector<1x8x1x1x16xbf16> to vector<8x16xbf16>
    %c0_42 = arith.constant 0 : index
    %c0_43 = arith.constant 0 : index
    %c0_44 = arith.constant 0 : index
    %c1_45 = arith.constant 1 : index
    %c0_46 = arith.constant 0 : index
    %41 = vector.load %arg5[%c0_42, %c0_43, %c0_44, %c1_45, %c0_46] : memref<1x8x1x2x16xbf16, #tpu.memory_space<vmem>>, vector<1x8x1x1x16xbf16>
    %42 = vector.shape_cast %41 : vector<1x8x1x1x16xbf16> to vector<8x16xbf16>
    %cst_47 = arith.constant dense<0.000000e+00> : vector<8x8xf32>
    %43 = tpu.matmul %38, %40, %cst_47 {dimension_numbers = #tpu.dot_dimension_numbers<[1], [1], [0], [0], [0, 0, 1, 0], [], []>} : vector<8x16xbf16>, vector<8x16xbf16>, vector<8x8xf32> -> vector<8x8xf32>
    %44 = vector.broadcast %4 : vector<1x8xf32> to vector<8x8xf32>
    %45 = arith.addf %43, %44 : vector<8x8xf32>
    %c0_48 = arith.constant 0 : index
    %c1_49 = arith.constant 1 : index
    %46 = vector.load %arg7[%c0_48, %c1_49] : memref<8x2xf32, #tpu.memory_space<vmem>>, vector<8x1xf32>
    %cst_50 = arith.constant dense<0xFF800000> : vector<8xf32>
    %47 = vector.multi_reduction <maximumf>, %45, %cst_50 [1] : vector<8x8xf32> to vector<8xf32>
    %48 = vector.shape_cast %47 : vector<8xf32> to vector<8x1xf32>
    %49 = arith.maximumf %46, %48 : vector<8x1xf32>
    %50 = arith.subf %46, %49 : vector<8x1xf32>
    %51 = math.exp %50 : vector<8x1xf32>
    %52 = vector.broadcast %49 : vector<8x1xf32> to vector<8x8xf32>
    %53 = arith.subf %45, %52 : vector<8x8xf32>
    %54 = math.exp %53 : vector<8x8xf32>
    %c0_51 = arith.constant 0 : index
    %c1_52 = arith.constant 1 : index
    %55 = vector.load %arg8[%c0_51, %c1_52] : memref<8x2xf32, #tpu.memory_space<vmem>>, vector<8x1xf32>
    %56 = arith.mulf %51, %55 : vector<8x1xf32>
    %cst_53 = arith.constant dense<0.000000e+00> : vector<8xf32>
    %57 = vector.multi_reduction <add>, %54, %cst_53 [1] : vector<8x8xf32> to vector<8xf32>
    %58 = vector.shape_cast %57 : vector<8xf32> to vector<8x1xf32>
    %59 = arith.addf %56, %58 : vector<8x1xf32>
    %c0_54 = arith.constant 0 : index
    %c1_55 = arith.constant 1 : index
    %60 = vector.load %arg8[%c0_54, %c1_55] : memref<8x2xf32, #tpu.memory_space<vmem>>, vector<8x1xf32>
    tpu.vector_store %arg8[%c0_54, %c1_55], %59 {strides = array<i32>} : memref<8x2xf32, #tpu.memory_space<vmem>>, vector<8x1xf32>,
    %c0_56 = arith.constant 0 : index
    %c16 = arith.constant 16 : index
    %61 = vector.load %arg9[%c0_56, %c16] : memref<8x32xf32, #tpu.memory_space<vmem>>, vector<8x16xf32>
    %62 = vector.broadcast %51 : vector<8x1xf32> to vector<8x16xf32>
    %63 = arith.mulf %62, %61 : vector<8x16xf32>
    %64 = arith.truncf %54 : vector<8x8xf32> to vector<8x8xbf16>
    %cst_57 = arith.constant dense<0.000000e+00> : vector<8x16xf32>
    %65 = tpu.matmul %64, %42, %cst_57 {dimension_numbers = #tpu.dot_dimension_numbers<[1], [0], [0], [1], [0, 0, 1, 1], [], []>} : vector<8x8xbf16>, vector<8x16xbf16>, vector<8x16xf32> -> vector<8x16xf32>
    %66 = arith.addf %63, %65 : vector<8x16xf32>
    %c0_58 = arith.constant 0 : index
    %c16_59 = arith.constant 16 : index
    %67 = vector.load %arg9[%c0_58, %c16_59] : memref<8x32xf32, #tpu.memory_space<vmem>>, vector<8x16xf32>
    tpu.vector_store %arg9[%c0_58, %c16_59], %66 {strides = array<i32>} : memref<8x32xf32, #tpu.memory_space<vmem>>, vector<8x16xf32>,
    %c0_60 = arith.constant 0 : index
    %c1_61 = arith.constant 1 : index
    %68 = vector.load %arg7[%c0_60, %c1_61] : memref<8x2xf32, #tpu.memory_space<vmem>>, vector<8x1xf32>
    tpu.vector_store %arg7[%c0_60, %c1_61], %49 {strides = array<i32>} : memref<8x2xf32, #tpu.memory_space<vmem>>, vector<8x1xf32>,
    %c0_i32_62 = arith.constant 0 : i32
    %69 = arith.cmpi eq, %arg1, %c0_i32_62 : i32
    %70 = arith.extui %69 : i1 to i32
    %c0_i32_63 = arith.constant 0 : i32
    %71 = arith.cmpi ne, %70, %c0_i32_63 : i32
    scf.if %71 {
      %c0_64 = arith.constant 0 : index
      %c0_65 = arith.constant 0 : index
      %72 = vector.load %arg8[%c0_64, %c0_65] : memref<8x2xf32, #tpu.memory_space<vmem>>, vector<8x1xf32>
      %73 = tpu.reciprocal %72 {approx = true} : vector<8x1xf32> -> vector<8x1xf32>
      %c0_66 = arith.constant 0 : index
      %c0_67 = arith.constant 0 : index
      %74 = vector.load %arg9[%c0_66, %c0_67] : memref<8x32xf32, #tpu.memory_space<vmem>>, vector<8x16xf32>
      %75 = vector.broadcast %73 : vector<8x1xf32> to vector<8x16xf32>
      %76 = arith.mulf %74, %75 : vector<8x16xf32>
      %77 = arith.truncf %76 : vector<8x16xf32> to vector<8x16xbf16>
      %c0_68 = arith.constant 0 : index
      %c0_69 = arith.constant 0 : index
      %c0_70 = arith.constant 0 : index
      %78 = vector.load %arg6[%c0_68, %c0_69, %c0_70] : memref<1x8x32xbf16, #tpu.memory_space<vmem>>, vector<1x8x16xbf16>
      %79 = vector.shape_cast %78 : vector<1x8x16xbf16> to vector<8x16xbf16>
      %80 = vector.shape_cast %77 : vector<8x16xbf16> to vector<1x8x16xbf16>
      tpu.vector_store %arg6[%c0_68, %c0_69, %c0_70], %80 {strides = array<i32>} : memref<1x8x32xbf16, #tpu.memory_space<vmem>>, vector<1x8x16xbf16>,
      %c0_71 = arith.constant 0 : index
      %c1_72 = arith.constant 1 : index
      %81 = vector.load %arg8[%c0_71, %c1_72] : memref<8x2xf32, #tpu.memory_space<vmem>>, vector<8x1xf32>
      %82 = tpu.reciprocal %81 {approx = true} : vector<8x1xf32> -> vector<8x1xf32>
      %c0_73 = arith.constant 0 : index
      %c16_74 = arith.constant 16 : index
      %83 = vector.load %arg9[%c0_73, %c16_74] : memref<8x32xf32, #tpu.memory_space<vmem>>, vector<8x16xf32>
      %84 = vector.broadcast %82 : vector<8x1xf32> to vector<8x16xf32>
      %85 = arith.mulf %83, %84 : vector<8x16xf32>
      %86 = arith.truncf %85 : vector<8x16xf32> to vector<8x16xbf16>
      %c0_75 = arith.constant 0 : index
      %c0_76 = arith.constant 0 : index
      %c16_77 = arith.constant 16 : index
      %87 = vector.load %arg6[%c0_75, %c0_76, %c16_77] : memref<1x8x32xbf16, #tpu.memory_space<vmem>>, vector<1x8x16xbf16>
      %88 = vector.shape_cast %87 : vector<1x8x16xbf16> to vector<8x16xbf16>
      %89 = vector.shape_cast %86 : vector<8x16xbf16> to vector<1x8x16xbf16>
      tpu.vector_store %arg6[%c0_75, %c0_76, %c16_77], %89 {strides = array<i32>} : memref<1x8x32xbf16, #tpu.memory_space<vmem>>, vector<1x8x16xbf16>,
    } else {
    }
    return
  }
  func.func @transform_0(%arg0: i32, %arg1: i32) -> (i32, i32, i32) {
    %c0_i32 = arith.constant 0 : i32
    %c0_i32_0 = arith.constant 0 : i32
    return %arg0, %c0_i32, %arg1 : i32, i32, i32
  }
  func.func @transform_1(%arg0: i32, %arg1: i32) -> (i32, i32, i32, i32, i32) {
    %c0_i32 = arith.constant 0 : i32
    %c0_i32_0 = arith.constant 0 : i32
    %c0_i32_1 = arith.constant 0 : i32
    %c0_i32_2 = arith.constant 0 : i32
    %c0_i32_3 = arith.constant 0 : i32
    return %arg0, %c0_i32, %c0_i32_0, %c0_i32_1, %c0_i32_2 : i32, i32, i32, i32, i32
  }
  func.func @transform_2(%arg0: i32, %arg1: i32) -> (i32, i32, i32, i32, i32) {
    %c1_i32 = arith.constant 1 : i32
    %c0_i32 = arith.constant 0 : i32
    %c0_i32_0 = arith.constant 0 : i32
    %c0_i32_1 = arith.constant 0 : i32
    return %arg0, %arg1, %c1_i32, %c0_i32, %c0_i32_0 : i32, i32, i32, i32, i32
  }
  func.func @transform_3(%arg0: i32, %arg1: i32) -> (i32, i32, i32, i32, i32) {
    %c2_i32 = arith.constant 2 : i32
    %c0_i32 = arith.constant 0 : i32
    %c0_i32_0 = arith.constant 0 : i32
    %c0_i32_1 = arith.constant 0 : i32
    return %arg0, %arg1, %c2_i32, %c0_i32, %c0_i32_0 : i32, i32, i32, i32, i32
  }
  func.func @transform_4(%arg0: i32, %arg1: i32) -> (i32, i32, i32) {
    %c0_i32 = arith.constant 0 : i32
    %c0_i32_0 = arith.constant 0 : i32
    %c0_i32_1 = arith.constant 0 : i32
    return %arg0, %c0_i32, %c0_i32_0 : i32, i32, i32
  }
}

module attributes {stable_mosaic.version = 11 : i64} {
  func.func @_dense_res_ln_kernel(%arg0: i32, %arg1: memref<8x32xbf16, #tpu.memory_space<vmem>>, %arg2: memref<32x32xbf16, #tpu.memory_space<vmem>>, %arg3: memref<1x32xf32, #tpu.memory_space<vmem>>, %arg4: memref<8x32xbf16, #tpu.memory_space<vmem>>, %arg5: memref<1x32xf32, #tpu.memory_space<vmem>>, %arg6: memref<1x32xf32, #tpu.memory_space<vmem>>, %arg7: memref<8x32xbf16, #tpu.memory_space<vmem>>) attributes {dimension_semantics = [#tpu.dimension_semantics<parallel>], iteration_bounds = array<i64: 2>, scalar_prefetch = 0 : i64, scratch_operands = 0 : i64, tpu.core_type = #tpu.core_type<tc>, window_params = [{transform_indices = @transform_0, window_bounds = array<i64: 8, 32>}, {pipeline_mode = #tpu.pipeline_mode<synchronous>, transform_indices = @transform_1, window_bounds = array<i64: 32, 32>}, {pipeline_mode = #tpu.pipeline_mode<synchronous>, transform_indices = @transform_2, window_bounds = array<i64: 1, 32>}, {transform_indices = @transform_3, window_bounds = array<i64: 8, 32>}, {pipeline_mode = #tpu.pipeline_mode<synchronous>, transform_indices = @transform_4, window_bounds = array<i64: 1, 32>}, {pipeline_mode = #tpu.pipeline_mode<synchronous>, transform_indices = @transform_5, window_bounds = array<i64: 1, 32>}, {transform_indices = @transform_6, window_bounds = array<i64: 8, 32>}]} {
    %c0 = arith.constant 0 : index
    %c0_0 = arith.constant 0 : index
    %0 = vector.load %arg1[%c0, %c0_0] : memref<8x32xbf16, #tpu.memory_space<vmem>>, vector<8x32xbf16>
    %c0_1 = arith.constant 0 : index
    %c0_2 = arith.constant 0 : index
    %1 = vector.load %arg2[%c0_1, %c0_2] : memref<32x32xbf16, #tpu.memory_space<vmem>>, vector<32x32xbf16>
    %cst = arith.constant dense<0.000000e+00> : vector<8x32xf32>
    %2 = tpu.matmul %0, %1, %cst {dimension_numbers = #tpu.dot_dimension_numbers<[1], [0], [0], [1], [0, 0, 1, 1], [], []>} : vector<8x32xbf16>, vector<32x32xbf16>, vector<8x32xf32> -> vector<8x32xf32>
    %c0_3 = arith.constant 0 : index
    %c0_4 = arith.constant 0 : index
    %3 = vector.load %arg3[%c0_3, %c0_4] : memref<1x32xf32, #tpu.memory_space<vmem>>, vector<1x32xf32>
    %4 = vector.broadcast %3 : vector<1x32xf32> to vector<8x32xf32>
    %5 = arith.addf %2, %4 : vector<8x32xf32>
    %c0_5 = arith.constant 0 : index
    %c0_6 = arith.constant 0 : index
    %6 = vector.load %arg4[%c0_5, %c0_6] : memref<8x32xbf16, #tpu.memory_space<vmem>>, vector<8x32xbf16>
    %7 = arith.extf %6 : vector<8x32xbf16> to vector<8x32xf32>
    %8 = arith.addf %5, %7 : vector<8x32xf32>
    %cst_7 = arith.constant dense<0.000000e+00> : vector<8xf32>
    %9 = vector.multi_reduction <add>, %8, %cst_7 [1] : vector<8x32xf32> to vector<8xf32>
    %10 = vector.shape_cast %9 : vector<8xf32> to vector<8x1xf32>
    %cst_8 = arith.constant 3.200000e+01 : f32
    %11 = vector.broadcast %cst_8 : f32 to vector<8x1xf32>
    %12 = arith.divf %10, %11 : vector<8x1xf32>
    %13 = vector.broadcast %12 : vector<8x1xf32> to vector<8x32xf32>
    %14 = arith.subf %8, %13 : vector<8x32xf32>
    %15 = arith.mulf %14, %14 : vector<8x32xf32>
    %cst_9 = arith.constant dense<0.000000e+00> : vector<8xf32>
    %16 = vector.multi_reduction <add>, %15, %cst_9 [1] : vector<8x32xf32> to vector<8xf32>
    %17 = vector.shape_cast %16 : vector<8xf32> to vector<8x1xf32>
    %cst_10 = arith.constant 3.200000e+01 : f32
    %18 = vector.broadcast %cst_10 : f32 to vector<8x1xf32>
    %19 = arith.divf %17, %18 : vector<8x1xf32>
    %cst_11 = arith.constant 9.99999996E-13 : f32
    %20 = vector.broadcast %cst_11 : f32 to vector<8x1xf32>
    %21 = arith.addf %19, %20 : vector<8x1xf32>
    %22 = math.rsqrt %21 : vector<8x1xf32>
    %23 = vector.broadcast %22 : vector<8x1xf32> to vector<8x32xf32>
    %24 = arith.mulf %14, %23 : vector<8x32xf32>
    %c0_12 = arith.constant 0 : index
    %c0_13 = arith.constant 0 : index
    %25 = vector.load %arg5[%c0_12, %c0_13] : memref<1x32xf32, #tpu.memory_space<vmem>>, vector<1x32xf32>
    %26 = vector.broadcast %25 : vector<1x32xf32> to vector<8x32xf32>
    %27 = arith.mulf %24, %26 : vector<8x32xf32>
    %c0_14 = arith.constant 0 : index
    %c0_15 = arith.constant 0 : index
    %28 = vector.load %arg6[%c0_14, %c0_15] : memref<1x32xf32, #tpu.memory_space<vmem>>, vector<1x32xf32>
    %29 = vector.broadcast %28 : vector<1x32xf32> to vector<8x32xf32>
    %30 = arith.addf %27, %29 : vector<8x32xf32>
    %31 = arith.truncf %30 : vector<8x32xf32> to vector<8x32xbf16>
    %c0_16 = arith.constant 0 : index
    %c0_17 = arith.constant 0 : index
    %32 = vector.load %arg7[%c0_16, %c0_17] : memref<8x32xbf16, #tpu.memory_space<vmem>>, vector<8x32xbf16>
    tpu.vector_store %arg7[%c0_16, %c0_17], %31 {strides = array<i32>} : memref<8x32xbf16, #tpu.memory_space<vmem>>, vector<8x32xbf16>,
    return
  }
  func.func @transform_0(%arg0: i32) -> (i32, i32) {
    %c0_i32 = arith.constant 0 : i32
    %c0_i32_0 = arith.constant 0 : i32
    return %arg0, %c0_i32 : i32, i32
  }
  func.func @transform_1(%arg0: i32) -> (i32, i32) {
    %c0_i32 = arith.constant 0 : i32
    %c0_i32_0 = arith.constant 0 : i32
    %c0_i32_1 = arith.constant 0 : i32
    return %c0_i32, %c0_i32_0 : i32, i32
  }
  func.func @transform_2(%arg0: i32) -> (i32, i32) {
    %c0_i32 = arith.constant 0 : i32
    %c0_i32_0 = arith.constant 0 : i32
    %c0_i32_1 = arith.constant 0 : i32
    return %c0_i32, %c0_i32_0 : i32, i32
  }
  func.func @transform_3(%arg0: i32) -> (i32, i32) {
    %c0_i32 = arith.constant 0 : i32
    %c0_i32_0 = arith.constant 0 : i32
    return %arg0, %c0_i32 : i32, i32
  }
  func.func @transform_4(%arg0: i32) -> (i32, i32) {
    %c0_i32 = arith.constant 0 : i32
    %c0_i32_0 = arith.constant 0 : i32
    %c0_i32_1 = arith.constant 0 : i32
    return %c0_i32, %c0_i32_0 : i32, i32
  }
  func.func @transform_5(%arg0: i32) -> (i32, i32) {
    %c0_i32 = arith.constant 0 : i32
    %c0_i32_0 = arith.constant 0 : i32
    %c0_i32_1 = arith.constant 0 : i32
    return %c0_i32, %c0_i32_0 : i32, i32
  }
  func.func @transform_6(%arg0: i32) -> (i32, i32) {
    %c0_i32 = arith.constant 0 : i32
    %c0_i32_0 = arith.constant 0 : i32
    return %arg0, %c0_i32 : i32, i32
  }
}

module attributes {stable_mosaic.version = 11 : i64} {
  func.func @_dense_kernel(%arg0: i32, %arg1: i32, %arg2: memref<8x32xbf16, #tpu.memory_space<vmem>>, %arg3: memref<32x64xbf16, #tpu.memory_space<vmem>>, %arg4: memref<1x64xf32, #tpu.memory_space<vmem>>, %arg5: memref<8x64xbf16, #tpu.memory_space<vmem>>) attributes {dimension_semantics = [#tpu.dimension_semantics<parallel>, #tpu.dimension_semantics<parallel>], iteration_bounds = array<i64: 1, 2>, scalar_prefetch = 0 : i64, scratch_operands = 0 : i64, tpu.core_type = #tpu.core_type<tc>, window_params = [{transform_indices = @transform_0, window_bounds = array<i64: 8, 32>}, {transform_indices = @transform_1, window_bounds = array<i64: 32, 64>}, {transform_indices = @transform_2, window_bounds = array<i64: 1, 64>}, {transform_indices = @transform_3, window_bounds = array<i64: 8, 64>}]} {
    %c0 = arith.constant 0 : index
    %c0_0 = arith.constant 0 : index
    %0 = vector.load %arg2[%c0, %c0_0] : memref<8x32xbf16, #tpu.memory_space<vmem>>, vector<8x32xbf16>
    %c0_1 = arith.constant 0 : index
    %c0_2 = arith.constant 0 : index
    %1 = vector.load %arg3[%c0_1, %c0_2] : memref<32x64xbf16, #tpu.memory_space<vmem>>, vector<32x64xbf16>
    %cst = arith.constant dense<0.000000e+00> : vector<8x64xf32>
    %2 = tpu.matmul %0, %1, %cst {dimension_numbers = #tpu.dot_dimension_numbers<[1], [0], [0], [1], [0, 0, 1, 1], [], []>} : vector<8x32xbf16>, vector<32x64xbf16>, vector<8x64xf32> -> vector<8x64xf32>
    %c0_3 = arith.constant 0 : index
    %c0_4 = arith.constant 0 : index
    %3 = vector.load %arg4[%c0_3, %c0_4] : memref<1x64xf32, #tpu.memory_space<vmem>>, vector<1x64xf32>
    %4 = vector.broadcast %3 : vector<1x64xf32> to vector<8x64xf32>
    %5 = arith.addf %2, %4 : vector<8x64xf32>
    %6 = arith.mulf %5, %5 : vector<8x64xf32>
    %7 = arith.mulf %5, %6 : vector<8x64xf32>
    %cst_5 = arith.constant 4.471500e-02 : f32
    %8 = vector.broadcast %cst_5 : f32 to vector<8x64xf32>
    %9 = arith.mulf %8, %7 : vector<8x64xf32>
    %10 = arith.addf %5, %9 : vector<8x64xf32>
    %cst_6 = arith.constant 0.797884583 : f32
    %11 = vector.broadcast %cst_6 : f32 to vector<8x64xf32>
    %12 = arith.mulf %11, %10 : vector<8x64xf32>
    %13 = math.tanh %12 : vector<8x64xf32>
    %cst_7 = arith.constant 1.000000e+00 : f32
    %14 = vector.broadcast %cst_7 : f32 to vector<8x64xf32>
    %15 = arith.addf %14, %13 : vector<8x64xf32>
    %cst_8 = arith.constant 5.000000e-01 : f32
    %16 = vector.broadcast %cst_8 : f32 to vector<8x64xf32>
    %17 = arith.mulf %16, %15 : vector<8x64xf32>
    %18 = arith.mulf %5, %17 : vector<8x64xf32>
    %19 = arith.truncf %18 : vector<8x64xf32> to vector<8x64xbf16>
    %c0_9 = arith.constant 0 : index
    %c0_10 = arith.constant 0 : index
    %20 = vector.load %arg5[%c0_9, %c0_10] : memref<8x64xbf16, #tpu.memory_space<vmem>>, vector<8x64xbf16>
    tpu.vector_store %arg5[%c0_9, %c0_10], %19 {strides = array<i32>} : memref<8x64xbf16, #tpu.memory_space<vmem>>, vector<8x64xbf16>,
    return
  }
  func.func @transform_0(%arg0: i32, %arg1: i32) -> (i32, i32) {
    %c0_i32 = arith.constant 0 : i32
    %c0_i32_0 = arith.constant 0 : i32
    return %arg1, %c0_i32 : i32, i32
  }
  func.func @transform_1(%arg0: i32, %arg1: i32) -> (i32, i32) {
    %c0_i32 = arith.constant 0 : i32
    %c0_i32_0 = arith.constant 0 : i32
    return %c0_i32, %arg0 : i32, i32
  }
  func.func @transform_2(%arg0: i32, %arg1: i32) -> (i32, i32) {
    %c0_i32 = arith.constant 0 : i32
    %c0_i32_0 = arith.constant 0 : i32
    return %c0_i32, %arg0 : i32, i32
  }
  func.func @transform_3(%arg0: i32, %arg1: i32) -> (i32, i32) {
    %c0_i32 = arith.constant 0 : i32
    return %arg1, %arg0 : i32, i32
  }
}

module attributes {stable_mosaic.version = 11 : i64} {
  func.func @_dense_res_ln_kernel(%arg0: i32, %arg1: memref<8x64xbf16, #tpu.memory_space<vmem>>, %arg2: memref<64x32xbf16, #tpu.memory_space<vmem>>, %arg3: memref<1x32xf32, #tpu.memory_space<vmem>>, %arg4: memref<8x32xbf16, #tpu.memory_space<vmem>>, %arg5: memref<1x32xf32, #tpu.memory_space<vmem>>, %arg6: memref<1x32xf32, #tpu.memory_space<vmem>>, %arg7: memref<8x32xbf16, #tpu.memory_space<vmem>>) attributes {dimension_semantics = [#tpu.dimension_semantics<parallel>], iteration_bounds = array<i64: 2>, scalar_prefetch = 0 : i64, scratch_operands = 0 : i64, tpu.core_type = #tpu.core_type<tc>, window_params = [{transform_indices = @transform_0, window_bounds = array<i64: 8, 64>}, {pipeline_mode = #tpu.pipeline_mode<synchronous>, transform_indices = @transform_1, window_bounds = array<i64: 64, 32>}, {pipeline_mode = #tpu.pipeline_mode<synchronous>, transform_indices = @transform_2, window_bounds = array<i64: 1, 32>}, {transform_indices = @transform_3, window_bounds = array<i64: 8, 32>}, {pipeline_mode = #tpu.pipeline_mode<synchronous>, transform_indices = @transform_4, window_bounds = array<i64: 1, 32>}, {pipeline_mode = #tpu.pipeline_mode<synchronous>, transform_indices = @transform_5, window_bounds = array<i64: 1, 32>}, {transform_indices = @transform_6, window_bounds = array<i64: 8, 32>}]} {
    %c0 = arith.constant 0 : index
    %c0_0 = arith.constant 0 : index
    %0 = vector.load %arg1[%c0, %c0_0] : memref<8x64xbf16, #tpu.memory_space<vmem>>, vector<8x64xbf16>
    %c0_1 = arith.constant 0 : index
    %c0_2 = arith.constant 0 : index
    %1 = vector.load %arg2[%c0_1, %c0_2] : memref<64x32xbf16, #tpu.memory_space<vmem>>, vector<64x32xbf16>
    %cst = arith.constant dense<0.000000e+00> : vector<8x32xf32>
    %2 = tpu.matmul %0, %1, %cst {dimension_numbers = #tpu.dot_dimension_numbers<[1], [0], [0], [1], [0, 0, 1, 1], [], []>} : vector<8x64xbf16>, vector<64x32xbf16>, vector<8x32xf32> -> vector<8x32xf32>
    %c0_3 = arith.constant 0 : index
    %c0_4 = arith.constant 0 : index
    %3 = vector.load %arg3[%c0_3, %c0_4] : memref<1x32xf32, #tpu.memory_space<vmem>>, vector<1x32xf32>
    %4 = vector.broadcast %3 : vector<1x32xf32> to vector<8x32xf32>
    %5 = arith.addf %2, %4 : vector<8x32xf32>
    %c0_5 = arith.constant 0 : index
    %c0_6 = arith.constant 0 : index
    %6 = vector.load %arg4[%c0_5, %c0_6] : memref<8x32xbf16, #tpu.memory_space<vmem>>, vector<8x32xbf16>
    %7 = arith.extf %6 : vector<8x32xbf16> to vector<8x32xf32>
    %8 = arith.addf %5, %7 : vector<8x32xf32>
    %cst_7 = arith.constant dense<0.000000e+00> : vector<8xf32>
    %9 = vector.multi_reduction <add>, %8, %cst_7 [1] : vector<8x32xf32> to vector<8xf32>
    %10 = vector.shape_cast %9 : vector<8xf32> to vector<8x1xf32>
    %cst_8 = arith.constant 3.200000e+01 : f32
    %11 = vector.broadcast %cst_8 : f32 to vector<8x1xf32>
    %12 = arith.divf %10, %11 : vector<8x1xf32>
    %13 = vector.broadcast %12 : vector<8x1xf32> to vector<8x32xf32>
    %14 = arith.subf %8, %13 : vector<8x32xf32>
    %15 = arith.mulf %14, %14 : vector<8x32xf32>
    %cst_9 = arith.constant dense<0.000000e+00> : vector<8xf32>
    %16 = vector.multi_reduction <add>, %15, %cst_9 [1] : vector<8x32xf32> to vector<8xf32>
    %17 = vector.shape_cast %16 : vector<8xf32> to vector<8x1xf32>
    %cst_10 = arith.constant 3.200000e+01 : f32
    %18 = vector.broadcast %cst_10 : f32 to vector<8x1xf32>
    %19 = arith.divf %17, %18 : vector<8x1xf32>
    %cst_11 = arith.constant 9.99999996E-13 : f32
    %20 = vector.broadcast %cst_11 : f32 to vector<8x1xf32>
    %21 = arith.addf %19, %20 : vector<8x1xf32>
    %22 = math.rsqrt %21 : vector<8x1xf32>
    %23 = vector.broadcast %22 : vector<8x1xf32> to vector<8x32xf32>
    %24 = arith.mulf %14, %23 : vector<8x32xf32>
    %c0_12 = arith.constant 0 : index
    %c0_13 = arith.constant 0 : index
    %25 = vector.load %arg5[%c0_12, %c0_13] : memref<1x32xf32, #tpu.memory_space<vmem>>, vector<1x32xf32>
    %26 = vector.broadcast %25 : vector<1x32xf32> to vector<8x32xf32>
    %27 = arith.mulf %24, %26 : vector<8x32xf32>
    %c0_14 = arith.constant 0 : index
    %c0_15 = arith.constant 0 : index
    %28 = vector.load %arg6[%c0_14, %c0_15] : memref<1x32xf32, #tpu.memory_space<vmem>>, vector<1x32xf32>
    %29 = vector.broadcast %28 : vector<1x32xf32> to vector<8x32xf32>
    %30 = arith.addf %27, %29 : vector<8x32xf32>
    %31 = arith.truncf %30 : vector<8x32xf32> to vector<8x32xbf16>
    %c0_16 = arith.constant 0 : index
    %c0_17 = arith.constant 0 : index
    %32 = vector.load %arg7[%c0_16, %c0_17] : memref<8x32xbf16, #tpu.memory_space<vmem>>, vector<8x32xbf16>
    tpu.vector_store %arg7[%c0_16, %c0_17], %31 {strides = array<i32>} : memref<8x32xbf16, #tpu.memory_space<vmem>>, vector<8x32xbf16>,
    return
  }
  func.func @transform_0(%arg0: i32) -> (i32, i32) {
    %c0_i32 = arith.constant 0 : i32
    %c0_i32_0 = arith.constant 0 : i32
    return %arg0, %c0_i32 : i32, i32
  }
  func.func @transform_1(%arg0: i32) -> (i32, i32) {
    %c0_i32 = arith.constant 0 : i32
    %c0_i32_0 = arith.constant 0 : i32
    %c0_i32_1 = arith.constant 0 : i32
    return %c0_i32, %c0_i32_0 : i32, i32
  }
  func.func @transform_2(%arg0: i32) -> (i32, i32) {
    %c0_i32 = arith.constant 0 : i32
    %c0_i32_0 = arith.constant 0 : i32
    %c0_i32_1 = arith.constant 0 : i32
    return %c0_i32, %c0_i32_0 : i32, i32
  }
  func.func @transform_3(%arg0: i32) -> (i32, i32) {
    %c0_i32 = arith.constant 0 : i32
    %c0_i32_0 = arith.constant 0 : i32
    return %arg0, %c0_i32 : i32, i32
  }
  func.func @transform_4(%arg0: i32) -> (i32, i32) {
    %c0_i32 = arith.constant 0 : i32
    %c0_i32_0 = arith.constant 0 : i32
    %c0_i32_1 = arith.constant 0 : i32
    return %c0_i32, %c0_i32_0 : i32, i32
  }
  func.func @transform_5(%arg0: i32) -> (i32, i32) {
    %c0_i32 = arith.constant 0 : i32
    %c0_i32_0 = arith.constant 0 : i32
    %c0_i32_1 = arith.constant 0 : i32
    return %c0_i32, %c0_i32_0 : i32, i32
  }
  func.func @transform_6(%arg0: i32) -> (i32, i32) {
    %c0_i32 = arith.constant 0 : i32
    %c0_i32_0 = arith.constant 0 : i32
    return %arg0, %c0_i32 : i32, i32
  }
}

</mosaic_0001>

<bundles_post_ra>
// kernel: custom_labse_forward.12
= control target key start
LH: loop header
LB: loop body
LE: loop exit
PB: predicated region body
PF: predicated region fallthrough
CT: control target
= control target key end

     0   :  { %s488_s12 = smov 0   ;;  %s490_s13 = smov 0   ;;  %s530_s0 = inlined_call_operand.vmem [shape: bf16[16,32], index: 0, kind: input, shape index: {}]   ;;  %s531_s1 = inlined_call_operand.vmem [shape: bf16[32,96], index: 1, kind: input, shape index: {}]   ;;  %s532_s2 = inlined_call_operand.vmem [shape: f32[1,96], index: 2, kind: input, shape index: {}]   ;;  %s533_s3 = inlined_call_operand.vmem [shape: bf16[16,96], index: 3, kind: output, shape index: {}]  }
   0x1   :  { %s492_s14 = smov 0  }
   0x2 LB: > { %s22_s15 = sadd.s32 1, %s460_s13  ;;  %p394_p0 = scmp.ge.s32.totalorder %s464_s14, 1  ;;  %s464_s14 = sphi %s492_s14, %s13_s14   ;;  %s460_s13 = sphi %s490_s13, %s535_s13   ;;  %s456_s12 = sphi %s488_s12, %s534_s12  }
   0x3   : > { %p23_p1 = scmp.ge.s32.totalorder %s22_s15, 2  ;;  %p167_p2 = scmp.lt.s32.totalorder %s464_s14, 3 }
   0x5   : > { %s537_s15 = smov (%p23_p1, %s22_s15), 0  ;;  %p168_p3 = pnand %p394_p0, %p167_p2 }
   0x6   : > { %v440_v0 = vld [vmem:[%s531_s1] sm:$0xff] (!%p168_p3)   ;;  %v466_v1 = vmov (!%p168_p3), 0.0   ;;  %v441_v2 = vld [vmem:[%s531_s1 + $0x8] sm:$0xff] (!%p168_p3)   ;;  %vm467_vm0 = vmmov (!%p168_p3), 0   ;;  %p199_p4 = scmp.lt.s32.totalorder (!%p168_p3), %s456_s12, 1  ;;  %vm242_vm1 = vcmask (!%p168_p3), 261120  }
   0x7   : > { %171 = sbr.rel (%p168_p3) target bundleno = 235 (0xeb), region = 32  ;;  %406 = vmatprep.subr.bf16.mxu0 (!%p168_p3), %v466_v1  ;;  %410 = vmatprep.mubr.msk.bf16.mxu0 (!%p168_p3), %vm467_vm0, %v466_v1  ;;  %v397_v4 = vld [vmem:[%s532_s2] ss:$0 sm:$0xff] (!%p168_p3)  ;;  %vm287_vm2 = vcmask (!%p168_p3), 781312  }
   0x8   : > { %407 = vmatpush3.bf16.msra.mxu0 (!%p168_p3), %v440_v0 }
   0x9   : > { %408 = vmatprep.subr.bf16.mxu0 (!%p168_p3), %v466_v1 }
   0xc   : > { %409 = vmatpush3.bf16.msra.mxu0 (!%p168_p3), %v441_v2 }
   0xe   : > { %s539_s12 = smov (!%p199_p4, %s456_s12), 1 }
   0xf   : > { %s395_s20 = sshll.u32 %s539_s12, 2 }
  0x10   : > { %s202_s23 = scalar_lea.vmem %s530_s0, %s395_s20  ;;  %s216_s28 = scalar_lea.vmem %s533_s3, %s395_s20 }
  0x11   : > { %v218_v3 = vld [vmem:[%s202_s23] sm:$0xf] }
  0x12   : > { %411 = vmatmul.mubr.msk.bf16.vlgmr.msra.gmra.mrb[0].mxu0 %vm242_vm1, %v218_v3 }
  0xe5   : > { %v280_v5 = vpop.f32.mrb[0].mxu0 }
  0xe6   : > { %v281_v6 = vadd.f32 %v397_v4, %v280_v5  ;;  %v412_v7 = vpop.f32.mrb[1].mxu0 }
  0xe7   : > { %v283_v8 = vpop.f32.mrb[2].mxu0 }
  0xe8   : > { %v286_v9 = vpack.c.bf16 %v281_v6, %v281_v6  ;;  %v413_v10 = vpop.f32.mrb[3].mxu0 }
  0xea   : > { %288 = vst.msk [vmem:[%s216_s28] sm:$0xf] %vm287_vm2, %v286_v9 }
  0xeb PF: > { %s13_s14 = sadd.s32 1, %s464_s14   ;;  %s534_s12 = smov %s460_s13 }
  0xec   : > { %p10_p5 = scmp.ge.s32.totalorder %s13_s14, 4   ;;  %s535_s13 = smov %s537_s15 }
  0xee   :  { %12 = sbr.rel (!%p10_p5) target bundleno = 2 (0x2), region = 68 }

// kernel: custom_labse_forward.11
= control target key start
LH: loop header
LB: loop body
LE: loop exit
PB: predicated region body
PF: predicated region fallthrough
CT: control target
= control target key end

     0   :  { %s303_s12 = smov 0   ;;  %s326_s0 = inlined_call_operand.vmem [shape: f32[16,32], index: 0, kind: input, shape index: {}]   ;;  %s327_s1 = inlined_call_operand.vmem [shape: f32[1,32], index: 1, kind: input, shape index: {}]   ;;  %s328_s2 = inlined_call_operand.vmem [shape: f32[1,32], index: 2, kind: input, shape index: {}]   ;;  %s329_s3 = inlined_call_operand.vmem [shape: bf16[16,32], index: 3, kind: output, shape index: {}]  }
   0x1 LB: > { %s254_s13 = sadd.s32 4294967295, %s281_s12   ;;  %p258_p0 = scmp.ge.s32.totalorder %s281_s12, 1  ;;  %s281_s12 = sphi %s303_s12, %s13_s12  }
   0x2   : > { %p136_p1 = scmp.lt.s32.totalorder %s281_s12, 3 }
   0x4   : > { %p137_p2 = pnand %p258_p0, %p136_p1 }
   0x5   : > { %p158_p3 = scmp.lt.s32.totalorder (!%p137_p2), %s254_s13, 1  ;;  %vm167_vm0 = vcmask (!%p137_p2), 261120   ;;  %v261_v11 = vld [vmem:[%s327_s1] ss:$0 sm:$0xff] (!%p137_p2)  ;;  %vm199_vm1 = vcmask (!%p137_p2), 257024  }
   0x6   : > { %140 = sbr.rel (%p137_p2) target bundleno = 333 (0x14d), region = 32  ;;  %v262_v13 = vld [vmem:[%s328_s2] ss:$0 sm:$0xff] (!%p137_p2) }
   0xd   : > { %s331_s13 = smov (!%p158_p3, %s254_s13), 1 }
   0xe   : > { %s259_s14 = sshll.u32 %s331_s13, 3  ;;  %s260_s22 = sshll.u32 %s331_s13, 2 }
   0xf   : > { %s161_s17 = scalar_lea.vmem %s326_s0, %s259_s14  ;;  %s165_s25 = scalar_lea.vmem %s329_s3, %s260_s22 }
  0x10   : > { %v166_v0 = vld [vmem:[%s161_s17] sm:$0xff] }
  0x11   : > { %v168_v1 = vsel %vm167_vm0, %v166_v0, 0.0 }
  0x12   : > { %169 = vadd.xlane.f32.xlu0 %v168_v1 }
  0x9f   : > { %v170_v2 = vpop.xlane.xlu0 %169 }
  0xa0   : > { %v172_v3 = vmul.f32 0.03125, %v170_v2 }
  0xa2   : > { %v173_v4 = vsub.f32 %v166_v0, %v172_v3 }
  0xa4   : > { %v174_v5 = vmul.f32 %v173_v4, %v173_v4 }
  0xa6   : > { %v175_v6 = vsel %vm167_vm0, %v174_v5, 0.0 }
  0xa7   : > { %176 = vadd.xlane.f32.xlu0 %v175_v6 }
 0x134   : > { %v177_v7 = vpop.xlane.xlu0 %176 }
 0x135   : > { %v178_v8 = vmul.f32 0.03125, %v177_v7 }
 0x137   : > { %v179_v9 = vadd.f32 1e-12, %v178_v8 }
 0x139   : > { %273 = vrsqrt.f32 %v179_v9 }
 0x143   : > { %v274_v10 = vpop.eup %273 }
 0x144   : > { %v181_v12 = vmul.f32 %v274_v10, %v173_v4 }
 0x146   : > { %v189_v14 = vmul.f32 %v261_v11, %v181_v12 }
 0x148   : > { %v197_v15 = vadd.f32 %v262_v13, %v189_v14 }
 0x14a   : > { %v198_v16 = vpack.c.bf16 %v197_v15, %v197_v15 }
 0x14c   : > { %200 = vst.msk [vmem:[%s165_s25] sm:$0xf] %vm199_vm1, %v198_v16 }
 0x14d PF: > { %s13_s12 = sadd.s32 1, %s281_s12  }
 0x14e   : > { %p10_p4 = scmp.ge.s32.totalorder %s13_s12, 4  }
 0x150   :  { %12 = sbr.rel (!%p10_p4) target bundleno = 1 (0x1), region = 62 }

// kernel: custom_labse_forward.14
= control target key start
LH: loop header
LB: loop body
LE: loop exit
PB: predicated region body
PF: predicated region fallthrough
CT: control target
= control target key end

     0   :  { %s520_s21 = smov 0   ;;  %s563_s0 = inlined_call_operand.vmem [shape: bf16[16,32], index: 0, kind: input, shape index: {}]   ;;  %s564_s1 = inlined_call_operand.vmem [shape: bf16[32,32], index: 1, kind: input, shape index: {}]   ;;  %s565_s2 = inlined_call_operand.vmem [shape: f32[1,32], index: 2, kind: input, shape index: {}]   ;;  %s566_s3 = inlined_call_operand.vmem [shape: bf16[16,32], index: 3, kind: input, shape index: {}]   ;;  %s567_s4 = inlined_call_operand.vmem [shape: f32[1,32], index: 4, kind: input, shape index: {}]   ;;  %s568_s5 = inlined_call_operand.vmem [shape: f32[1,32], index: 5, kind: input, shape index: {}]   ;;  %s569_s6 = inlined_call_operand.vmem [shape: bf16[16,32], index: 6, kind: output, shape index: {}]  }
   0x1 LB: > { %s434_s22 = sadd.s32 4294967295, %s481_s21   ;;  %p438_p0 = scmp.ge.s32.totalorder %s481_s21, 1  ;;  %s481_s21 = sphi %s520_s21, %s16_s21  }
   0x2   : > { %p220_p1 = scmp.lt.s32.totalorder %s481_s21, 3 }
   0x4   : > { %p221_p2 = pnand %p438_p0, %p220_p1 }
   0x5   : > { %v471_v0 = vld [vmem:[%s564_s1] sm:$0xff] (!%p221_p2)   ;;  %v483_v1 = vmov (!%p221_p2), 0.0   ;;  %v472_v2 = vld [vmem:[%s564_s1 + $0x8] sm:$0xff] (!%p221_p2)   ;;  %vm484_vm0 = vmmov (!%p221_p2), 0   ;;  %p252_p3 = scmp.lt.s32.totalorder (!%p221_p2), %s434_s22, 1  ;;  %vm289_vm1 = vcmask (!%p221_p2), 261120  }
   0x6   : > { %224 = sbr.rel (%p221_p2) target bundleno = 549 (0x225), region = 44  ;;  %453 = vmatprep.subr.bf16.mxu0 (!%p221_p2), %v483_v1  ;;  %457 = vmatprep.mubr.msk.bf16.mxu0 (!%p221_p2), %vm484_vm0, %v483_v1  ;;  %v442_v5 = vld [vmem:[%s565_s2] ss:$0 sm:$0xff] (!%p221_p2)  ;;  %vm367_vm2 = vcmask (!%p221_p2), 257024  }
   0x7   : > { %454 = vmatpush3.bf16.msra.mxu0 (!%p221_p2), %v471_v0  ;;  %v446_v23 = vld [vmem:[%s567_s4] ss:$0 sm:$0xff] (!%p221_p2) }
   0x8   : > { %455 = vmatprep.subr.bf16.mxu0 (!%p221_p2), %v483_v1  ;;  %v447_v25 = vld [vmem:[%s568_s5] ss:$0 sm:$0xff] (!%p221_p2) }
   0xb   : > { %456 = vmatpush3.bf16.msra.mxu0 (!%p221_p2), %v472_v2 }
   0xd   : > { %s571_s22 = smov (!%p252_p3, %s434_s22), 1 }
   0xe   : > { %s534_s27 = sshll.u32 %s571_s22, 2 }
   0xf   : > { %s255_s30 = scalar_lea.vmem %s563_s0, %s534_s27  ;;  %s259_s9 = scalar_lea.vmem %s566_s3, %s534_s27 }
  0x10   : > { %v265_v3 = vld [vmem:[%s255_s30] sm:$0xf]  ;;  %s263_s18 = scalar_lea.vmem %s569_s6, %s534_s27 }
  0x11   : > { %458 = vmatmul.mubr.msk.bf16.vlgmr.msra.gmra.mrb[0].mxu0 %vm289_vm1, %v265_v3  ;;  %v333_v4 = vld [vmem:[%s259_s9] sm:$0xf] }
  0x12   : > { %v334_v6 = vunpack.c.l.bf16 %v333_v4 }
  0xe4   : > { %v327_v7 = vpop.f32.mrb[0].mxu0 }
  0xe5   : > { %v328_v8 = vadd.f32 %v442_v5, %v327_v7  ;;  %v459_v9 = vpop.f32.mrb[1].mxu0 }
  0xe6   : > { %v330_v10 = vpop.f32.mrb[2].mxu0 }
  0xe7   : > { %v460_v11 = vpop.f32.mrb[3].mxu0  ;;  %v335_v12 = vadd.f32 %v334_v6, %v328_v8 }
  0xe9   : > { %v336_v13 = vsel %vm289_vm1, %v335_v12, 0.0 }
  0xea   : > { %337 = vadd.xlane.f32.xlu0 %v336_v13 }
 0x177   : > { %v338_v14 = vpop.xlane.xlu0 %337 }
 0x178   : > { %v340_v15 = vmul.f32 0.03125, %v338_v14 }
 0x17a   : > { %v341_v16 = vsub.f32 %v335_v12, %v340_v15 }
 0x17c   : > { %v342_v17 = vmul.f32 %v341_v16, %v341_v16 }
 0x17e   : > { %v343_v18 = vsel %vm289_vm1, %v342_v17, 0.0 }
 0x17f   : > { %344 = vadd.xlane.f32.xlu0 %v343_v18 }
 0x20c   : > { %v345_v19 = vpop.xlane.xlu0 %344 }
 0x20d   : > { %v346_v20 = vmul.f32 0.03125, %v345_v19 }
 0x20f   : > { %v347_v21 = vadd.f32 1e-12, %v346_v20 }
 0x211   : > { %473 = vrsqrt.f32 %v347_v21 }
 0x21b   : > { %v474_v22 = vpop.eup %473 }
 0x21c   : > { %v349_v24 = vmul.f32 %v474_v22, %v341_v16 }
 0x21e   : > { %v357_v26 = vmul.f32 %v446_v23, %v349_v24 }
 0x220   : > { %v365_v27 = vadd.f32 %v447_v25, %v357_v26 }
 0x222   : > { %v366_v28 = vpack.c.bf16 %v365_v27, %v365_v27 }
 0x224   : > { %368 = vst.msk [vmem:[%s263_s18] sm:$0xf] %vm367_vm2, %v366_v28 }
 0x225 PF: > { %s16_s21 = sadd.s32 1, %s481_s21  }
 0x226   : > { %p13_p4 = scmp.ge.s32.totalorder %s16_s21, 4  }
 0x228   :  { %15 = sbr.rel (!%p13_p4) target bundleno = 1 (0x1), region = 77 }

// kernel: custom_labse_forward.13
= control target key start
LH: loop header
LB: loop body
LE: loop exit
PB: predicated region body
PF: predicated region fallthrough
CT: control target
= control target key end

     0   :  { %s2084_s15 = smov 0   ;;  %s2086_s16 = smov 0   ;;  %s2377_s0 = inlined_call_operand.vmem [shape: f32[2,1,8], index: 0, kind: input, shape index: {}]   ;;  %s2378_s1 = inlined_call_operand.vmem [shape: bf16[2,8,3,2,16], index: 1, kind: input, shape index: {}, may-alias: {1,2,3}]   ;;  %s2379_s2 = inlined_call_operand.vmem [shape: bf16[2,8,3,2,16], index: 2, kind: input, shape index: {}, may-alias: {1,2,3}]   ;;  %s2380_s3 = inlined_call_operand.vmem [shape: bf16[2,8,3,2,16], index: 3, kind: input, shape index: {}, may-alias: {1,2,3}]   ;;  %s2381_s4 = inlined_call_operand.vmem [shape: bf16[2,8,32], index: 4, kind: output, shape index: {}]  }
   0x1   :  { %s2088_s17 = smov 0   ;;  %s2090_s18 = smov 0  }
   0x2   :  { %s2092_s19 = smov 0  }
   0x3 LB: > { %s26_s20 = sadd.s32 1, %s2046_s18  ;;  %p68_p1 = scmp.ne.s32.totalorder %s2038_s16, %s2034_s15  ;;  %s2050_s19 = sphi %s2092_s19, %s14_s19   ;;  %s2046_s18 = sphi %s2090_s18, %s2386_s18   ;;  %s2042_s17 = sphi %s2088_s17, %s2385_s17   ;;  %s2038_s16 = sphi %s2086_s16, %s2384_s16   ;;  %s2034_s15 = sphi %s2084_s15, %s2383_s15  }
   0x4   : > { %p28_p0 = scmp.ge.s32.totalorder %s26_s20, 2  ;;  %p69_p2 = scmp.eq.s32.totalorder %s2050_s19, 0 }
   0x5   : > { %s61_s23 = sadd.s32 1, %s2038_s16  ;;  %p1837_p5 = scmp.ge.s32.totalorder %s2050_s19, 2 }
   0x6   : > { %s2388_s20 = smov (%p28_p0, %s26_s20), 0  ;;  %p2115_p3 = por %p69_p2, %p68_p1 }
   0x7   : > { %s58_s22 = ssub.s32 %s2046_s18, %s2388_s20  ;;  %176 = sbr.rel (%p1837_p5) target bundleno = 44 (0x2c), region = 16 }
   0x8   : > { %p59_p4 = scmp.eq.s32.totalorder %s58_s22, 0 }
   0xa   : > { %s2123_s24 = scalar_select %p59_p4, %s2038_s16, %s61_s23  }
   0xe   : > { %188 = sbr.rel (!%p2115_p3) target bundleno = 24 (0x18), region = 24  ;;  %s190_s25 = sand.u32 (%p2115_p3), 1, %s2038_s16  }
   0xf   : > { %s1949_s26 = smul.u32 (%p2115_p3), 24, %s2046_s18  ;;  %s1838_s27 = sshll.u32 (%p2115_p3), %s190_s25, 3 }
  0x10   : > { %s192_s5 = scalar_lea.vmem (%p2115_p3), [#allocation5], %s1838_s27 }
  0x11   : > { %s194_s30 = scalar_lea.vmem (%p2115_p3), %s2378_s1, %s1949_s26 }
  0x12   : > { %v210_v0 = vld [vmem:[%s194_s30] sm:$0x1] (%p2115_p3)  ;;  %v212_v1 = vld [vmem:[%s194_s30 + $0x3] sm:$0x1] (%p2115_p3)  ;;  %v214_v2 = vld [vmem:[%s194_s30 + $0x6] sm:$0x1] (%p2115_p3) }
  0x13   : > { %211 = vst [vmem:[%s192_s5] sm:$0x1] (%p2115_p3), %v210_v0  ;;  %213 = vst [vmem:[%s192_s5 + $0x1] sm:$0x1] (%p2115_p3), %v212_v1  ;;  %v216_v3 = vld [vmem:[%s194_s30 + $0x9] sm:$0x1] (%p2115_p3) }
  0x14   : > { %215 = vst [vmem:[%s192_s5 + $0x2] sm:$0x1] (%p2115_p3), %v214_v2  ;;  %v218_v4 = vld [vmem:[%s194_s30 + $0xc] sm:$0x1] (%p2115_p3)  ;;  %v220_v5 = vld [vmem:[%s194_s30 + $0xf] sm:$0x1] (%p2115_p3) }
  0x15   : > { %217 = vst [vmem:[%s192_s5 + $0x3] sm:$0x1] %v216_v3  ;;  %219 = vst [vmem:[%s192_s5 + $0x4] sm:$0x1] %v218_v4  ;;  %v222_v6 = vld [vmem:[%s194_s30 + $0x12] sm:$0x1] }
  0x16   : > { %221 = vst [vmem:[%s192_s5 + $0x5] sm:$0x1] %v220_v5  ;;  %v224_v7 = vld [vmem:[%s194_s30 + $0x15] sm:$0x1]  ;;  %223 = vst [vmem:[%s192_s5 + $0x6] sm:$0x1] %v222_v6 }
  0x17   : > { %225 = vst [vmem:[%s192_s5 + $0x7] sm:$0x1] %v224_v7 }
  0x18 PF: > { %264 = sbr.rel (!%p2115_p3) target bundleno = 34 (0x22), region = 65  ;;  %s266_s6 = sand.u32 (%p2115_p3), 1, %s2038_s16  }
  0x19   : > { %s1741_s7 = smul.u32 (%p2115_p3), 24, %s2046_s18  ;;  %s1839_s8 = sshll.u32 (%p2115_p3), %s266_s6, 3 }
  0x1a   : > { %s268_s12 = scalar_lea.vmem (%p2115_p3), [#allocation6], %s1839_s8 }
  0x1b   : > { %s1743_s11 = scalar_lea.vmem (%p2115_p3), %s2379_s2, %s1741_s7 }
  0x1c   : > { %v1840_v8 = vld [vmem:[%s1743_s11 + $0x1] sm:$0x1] (%p2115_p3)  ;;  %v1841_v9 = vld [vmem:[%s1743_s11 + $0x4] sm:$0x1] (%p2115_p3)  ;;  %v1842_v10 = vld [vmem:[%s1743_s11 + $0x7] sm:$0x1] (%p2115_p3) }
  0x1d   : > { %291 = vst [vmem:[%s268_s12] sm:$0x1] (%p2115_p3), %v1840_v8  ;;  %293 = vst [vmem:[%s268_s12 + $0x1] sm:$0x1] (%p2115_p3), %v1841_v9  ;;  %v1843_v11 = vld [vmem:[%s1743_s11 + $0xa] sm:$0x1] (%p2115_p3) }
  0x1e   : > { %295 = vst [vmem:[%s268_s12 + $0x2] sm:$0x1] (%p2115_p3), %v1842_v10  ;;  %v1844_v12 = vld [vmem:[%s1743_s11 + $0xd] sm:$0x1] (%p2115_p3)  ;;  %v1845_v13 = vld [vmem:[%s1743_s11 + $0x10] sm:$0x1] (%p2115_p3) }
  0x1f   : > { %297 = vst [vmem:[%s268_s12 + $0x3] sm:$0x1] %v1843_v11  ;;  %299 = vst [vmem:[%s268_s12 + $0x4] sm:$0x1] %v1844_v12  ;;  %v1846_v14 = vld [vmem:[%s1743_s11 + $0x13] sm:$0x1] }
  0x20   : > { %301 = vst [vmem:[%s268_s12 + $0x5] sm:$0x1] %v1845_v13  ;;  %v1847_v15 = vld [vmem:[%s1743_s11 + $0x16] sm:$0x1]  ;;  %303 = vst [vmem:[%s268_s12 + $0x6] sm:$0x1] %v1846_v14 }
  0x21   : > { %305 = vst [vmem:[%s268_s12 + $0x7] sm:$0x1] %v1847_v15 }
  0x22 PF: > { %344 = sbr.rel (!%p2115_p3) target bundleno = 44 (0x2c), region = 106  ;;  %s346_s13 = sand.u32 (%p2115_p3), 1, %s2038_s16  }
  0x23   : > { %s1748_s14 = smul.u32 (%p2115_p3), 24, %s2046_s18  ;;  %s1848_s22 = sshll.u32 (%p2115_p3), %s346_s13, 3 }
  0x24   : > { %s348_s27 = scalar_lea.vmem (%p2115_p3), [#allocation7], %s1848_s22 }
  0x25   : > { %s1750_s26 = scalar_lea.vmem (%p2115_p3), %s2380_s3, %s1748_s14 }
  0x26   : > { %v1849_v16 = vld [vmem:[%s1750_s26 + $0x2] sm:$0x1] (%p2115_p3)  ;;  %v1850_v17 = vld [vmem:[%s1750_s26 + $0x5] sm:$0x1] (%p2115_p3)  ;;  %v1851_v18 = vld [vmem:[%s1750_s26 + $0x8] sm:$0x1] (%p2115_p3) }
  0x27   : > { %371 = vst [vmem:[%s348_s27] sm:$0x1] (%p2115_p3), %v1849_v16  ;;  %373 = vst [vmem:[%s348_s27 + $0x1] sm:$0x1] (%p2115_p3), %v1850_v17  ;;  %v1852_v19 = vld [vmem:[%s1750_s26 + $0xb] sm:$0x1] (%p2115_p3) }
  0x28   : > { %375 = vst [vmem:[%s348_s27 + $0x2] sm:$0x1] (%p2115_p3), %v1851_v18  ;;  %v1853_v20 = vld [vmem:[%s1750_s26 + $0xe] sm:$0x1] (%p2115_p3)  ;;  %v1854_v21 = vld [vmem:[%s1750_s26 + $0x11] sm:$0x1] (%p2115_p3) }
  0x29   : > { %377 = vst [vmem:[%s348_s27 + $0x3] sm:$0x1] %v1852_v19  ;;  %379 = vst [vmem:[%s348_s27 + $0x4] sm:$0x1] %v1853_v20  ;;  %v1855_v22 = vld [vmem:[%s1750_s26 + $0x14] sm:$0x1] }
  0x2a   : > { %381 = vst [vmem:[%s348_s27 + $0x5] sm:$0x1] %v1854_v21  ;;  %v1856_v23 = vld [vmem:[%s1750_s26 + $0x17] sm:$0x1]  ;;  %383 = vst [vmem:[%s348_s27 + $0x6] sm:$0x1] %v1855_v22 }
  0x2b   : > { %385 = vst [vmem:[%s348_s27 + $0x7] sm:$0x1] %v1856_v23 }
  0x2c PF: > { %p1857_p6 = scmp.ge.s32.totalorder %s2050_s19, 1  ;;  %p423_p7 = scmp.lt.s32.totalorder %s2050_s19, 3 }
  0x2e   : > { %p424_p8 = pnand %p1857_p6, %p423_p7 }
  0x2f   : > { %s430_s21 = sand.u32 (!%p424_p8), 1, %s2034_s15   ;;  %v553_v24 = vlaneseq (!%p424_p8)  ;;  %v2052_v25 = vmov (!%p424_p8), 0.0   ;;  %v2053_v26 = vmov (!%p424_p8), 1966171168   ;;  %vm2054_vm0 = vmmov (!%p424_p8), 0   ;;  %p482_p9 = scmp.lt.s32.totalorder (!%p424_p8), %s2042_s17, 1 }
  0x30   : > { %427 = sbr.rel (%p424_p8) target bundleno = 1442 (0x5a2), region = 147  ;;  %1925 = vmatprep.subr.bf16.mxu0 (!%p424_p8), %v2052_v25  ;;  %s2151_s28 = sshll.u32 (!%p424_p8), %s430_s21, 3  ;;  %v551_v27 = vunpack.c.l.s4 (!%p424_p8), %v2053_v26  ;;  %1931 = vmatprep.subr.bf16.mxu1 (!%p424_p8), %v2052_v25  ;;  %vm664_vm1 = vcmask (!%p424_p8), 1041409   ;;  %vm667_vm2 = vcmask (!%p424_p8), 1042434   ;;  %vm670_vm3 = vcmask (!%p424_p8), 1043459  }
  0x31   : > { %v554_v28 = vshrl.u32 (!%p424_p8), %v553_v24, 7  ;;  %s439_s29 = scalar_lea.vmem (!%p424_p8), [#allocation6], %s2151_s28  ;;  %1927 = vmatprep.mubr.msk.bf16.mxu0 (!%p424_p8), %vm2054_vm0, %v2052_v25  ;;  %1933 = vmatprep.mubr.msk.bf16.mxu1 (!%p424_p8), %vm2054_vm0, %v2052_v25  ;;  %vm673_vm4 = vcmask (!%p424_p8), 1044484   ;;  %vm676_vm5 = vcmask (!%p424_p8), 1045509   ;;  %vm679_vm6 = vcmask (!%p424_p8), 1046534   ;;  %s2184_s15 = scalar_lea.vmem (!%p424_p8), [#allocation5], %s2151_s28 }
  0x32   : > { %v1871_v29 = vld.sshfl [vmem:[%s439_s29] sm:$0x1 pattern:$0x75316420] (!%p424_p8)  ;;  %v552_v30 = vunpack.c.0.s8 (!%p424_p8), %v551_v27  ;;  %vm682_vm7 = vcmask (!%p424_p8), 1047559   ;;  %vm828_vm8 = vcmask (!%p424_p8), 130048  }
  0x33   : > { %v1872_v31 = vld.sshfl [vmem:[%s439_s29 + $0x1] sm:$0x1 pattern:$0x75316420] (!%p424_p8)  ;;  %vm499_vm9 = vcmask (!%p424_p8), 15360   ;;  %vm876_vm10 = vcmask (!%p424_p8), 64512  }
  0x34   : > { %v1873_v32 = vld.sshfl [vmem:[%s439_s29 + $0x2] sm:$0x1 pattern:$0x75316420] (!%p424_p8)  ;;  %v2159_v33 = vsub.s32 (!%p424_p8), %v552_v30, %v554_v28  ;;  %501 = vst.msk [vmem:[#allocation3] sm:$0xff] (!%p424_p8), %vm499_vm9, %v2052_v25  ;;  %s446_s7 = scalar_lea.vmem (!%p424_p8), [#allocation7], %s2151_s28 }
  0x35   : > { %v1874_v34 = vld.sshfl [vmem:[%s439_s29 + $0x3] sm:$0x1 pattern:$0x75316420] (!%p424_p8)  ;;  %vm898_vm11 = vcmask (!%p424_p8), 7168   ;;  %vm1054_vm12 = vcmask (!%p424_p8), 1043456  }
  0x36   : > { %v1875_v35 = vld.sshfl [vmem:[%s439_s29 + $0x4] sm:$0x1 pattern:$0x75316420] (!%p424_p8)  ;;  %v706_v36 = vrot.slane (!%p424_p8), %v1871_v29, %v2159_v33  ;;  %v720_v37 = vrot.slane (!%p424_p8), %v1872_v31, %v2159_v33  ;;  %v734_v38 = vrot.slane (!%p424_p8), %v1873_v32, %v2159_v33  ;;  %v748_v39 = vrot.slane (!%p424_p8), %v1874_v34, %v2159_v33  ;;  %s2058_s8 = smov (!%p424_p8), 16  }
  0x37   : > { %v1876_v40 = vld.sshfl [vmem:[%s439_s29 + $0x5] sm:$0x1 pattern:$0x75316420]  ;;  %v762_v41 = vrot.slane %v1875_v35, %v2159_v33  ;;  %s2390_s17 = smov (!%p482_p9, %s2042_s17), 1  ;;  %vm1479_vm13 = vcmask 15368  }
  0x38   : > { %v1877_v42 = vld.sshfl [vmem:[%s439_s29 + $0x6] sm:$0x1 pattern:$0x75316420]  ;;  %v776_v43 = vrot.slane %v1876_v40, %v2159_v33  ;;  %v2167_v44 = vunpack.c.l.b16 %v706_v36  ;;  %v2169_v45 = vunpack.c.l.b16 %v720_v37  ;;  %v2171_v46 = vunpack.c.l.b16 %v734_v38  ;;  %s487_s6 = scalar_lea.vmem %s2377_s0, %s2390_s17  ;;  %s1861_s9 = sshll.u32 %s2390_s17, 2 }
  0x39   : > { %v1878_v47 = vld.sshfl [vmem:[%s439_s29 + $0x7] sm:$0x1 pattern:$0x75316420]  ;;  %v790_v48 = vrot.slane %v1877_v42, %v2159_v33  ;;  %v2174_v49 = vunpack.c.l.b16 %v748_v39  ;;  %v2176_v50 = vunpack.c.l.b16 %v762_v41  ;;  %vm502_vm14 = vcmask 261120   ;;  %s493_s12 = scalar_lea.vmem %s2381_s4, %s1861_s9 }
  0x3a   : > { %v804_v51 = vrot.slane %v1878_v47, %v2159_v33  ;;  %v2179_v52 = vunpack.c.l.b16 %v776_v43  ;;  %v813_v53 = vrot.slane %v2169_v45, 7  ;;  %v815_v54 = vrot.slane %v2171_v46, 6  ;;  %v1863_v55 = vld.sshfl [vmem:[%s2184_s15] sm:$0x1 pattern:$0x75316420] }
  0x3b   : > { %v2187_v56 = vunpack.c.l.b16 %v790_v48  ;;  %v817_v57 = vrot.slane %v2174_v49, 5  ;;  %v819_v58 = vrot.slane %v2176_v50, 4  ;;  %v1864_v59 = vld.sshfl [vmem:[%s2184_s15 + $0x1] sm:$0x1 pattern:$0x75316420]  ;;  %v556_v60 = vrot.slane %v1863_v55, %v2159_v33 }
  0x3c   : > { %v2193_v61 = vunpack.c.l.b16 %v804_v51  ;;  %v814_v62 = vsel %vm664_vm1, %v813_v53, %v2167_v44  ;;  %v821_v63 = vrot.slane %v2179_v52, 3  ;;  %v1865_v0 = vld.sshfl [vmem:[%s2184_s15 + $0x2] sm:$0x1 pattern:$0x75316420]  ;;  %v570_v1 = vrot.slane %v1864_v59, %v2159_v33  ;;  %503 = vst.msk [vmem:[#allocation4] sm:$0xff] %vm502_vm14, %v2052_v25 }
  0x3d   : > { %v816_v2 = vsel %vm667_vm2, %v815_v54, %v814_v62  ;;  %v823_v3 = vrot.slane %v2187_v56, 2  ;;  %v1866_v4 = vld.sshfl [vmem:[%s2184_s15 + $0x3] sm:$0x1 pattern:$0x75316420]  ;;  %v584_v5 = vrot.slane %v1865_v0, %v2159_v33  ;;  %v2204_v6 = vunpack.c.l.b16 %v556_v60 }
  0x3e   : > { %v818_v7 = vsel %vm670_vm3, %v817_v57, %v816_v2  ;;  %v825_v8 = vrot.slane %v2193_v61, 1  ;;  %v1867_v9 = vld.sshfl [vmem:[%s2184_s15 + $0x4] sm:$0x1 pattern:$0x75316420]  ;;  %v598_v10 = vrot.slane %v1866_v4, %v2159_v33  ;;  %v2210_v11 = vunpack.c.l.b16 %v570_v1 }
  0x3f   : > { %v820_v12 = vsel %vm673_vm4, %v819_v58, %v818_v7  ;;  %v1868_v13 = vld.sshfl [vmem:[%s2184_s15 + $0x5] sm:$0x1 pattern:$0x75316420]  ;;  %v612_v14 = vrot.slane %v1867_v9, %v2159_v33  ;;  %v2215_v15 = vunpack.c.l.b16 %v584_v5  ;;  %v2055_v54 = vmov -inf  }
  0x40   : > { %v822_v16 = vsel %vm676_vm5, %v821_v63, %v820_v12  ;;  %v1869_v17 = vld.sshfl [vmem:[%s2184_s15 + $0x6] sm:$0x1 pattern:$0x75316420]  ;;  %v626_v18 = vrot.slane %v1868_v13, %v2159_v33  ;;  %v2220_v19 = vunpack.c.l.b16 %v598_v10  ;;  %v663_v20 = vrot.slane %v2210_v11, 7  ;;  %500 = vst.msk [vmem:[#allocation2] sm:$0xff] %vm499_vm9, %v2055_v54 }
  0x41   : > { %v824_v21 = vsel %vm679_vm6, %v823_v3, %v822_v16  ;;  %v1870_v22 = vld.sshfl [vmem:[%s2184_s15 + $0x7] sm:$0x1 pattern:$0x75316420]  ;;  %v640_v23 = vrot.slane %v1869_v17, %v2159_v33  ;;  %v2226_v24 = vunpack.c.l.b16 %v612_v14  ;;  %v666_v26 = vrot.slane %v2215_v15, 6 }
  0x42   : > { %v826_v27 = vsel %vm682_vm7, %v825_v8, %v824_v21  ;;  %v654_v28 = vrot.slane %v1870_v22, %v2159_v33  ;;  %v2231_v29 = vunpack.c.l.b16 %v626_v18  ;;  %v665_v30 = vsel %vm664_vm1, %v663_v20, %v2204_v6  ;;  %v2264_v55 = vld [vmem:[%s487_s6] ss:$0 sm:$0xff]  ;;  %v1881_v1 = vld.sshfl [vmem:[%s446_s7 + $0x1] sm:$0x1 pattern:$0x75316420] }
  0x43   : > { %v827_v31 = vpack.c.b16 %v826_v27, %v826_v27  ;;  %v2235_v32 = vunpack.c.l.b16 %v640_v23  ;;  %v668_v34 = vsel %vm667_vm2, %v666_v26, %v665_v30  ;;  %v669_v35 = vrot.slane %v2220_v19, 5  ;;  %v1882_v2 = vld.sshfl [vmem:[%s446_s7 + $0x2] sm:$0x1 pattern:$0x75316420] }
  0x44   : > { %v2239_v36 = vunpack.c.l.b16 %v654_v28  ;;  %v672_v37 = vrot.slane %v2226_v24, 4  ;;  %v675_v38 = vrot.slane %v2231_v29, 3  ;;  %v2056_v0 = vmov 0  }
  0x45   : > { %v833_v39 = vsel %vm828_vm8, %v827_v31, 0  ;;  %v671_v40 = vsel %vm670_vm3, %v669_v35, %v668_v34  ;;  %v678_v41 = vrot.slane %v2235_v32, 2  ;;  %1997 = vset.pattern.permute.xlu0 %v2056_v0  ;;  %v943_v3 = vrot.slane %v1881_v1, %v2159_v33  ;;  %v1880_v4 = vld.sshfl [vmem:[%s446_s7] sm:$0x1 pattern:$0x75316420] }
  0x46   : > { %1926 = vmatpush3.bf16.xpose.msra.mxu0 %v833_v39  ;;  %v674_v42 = vsel %vm673_vm4, %v672_v37, %v671_v40  ;;  %v681_v43 = vrot.slane %v2239_v36, 1  ;;  %v957_v5 = vrot.slane %v1882_v2, %v2159_v33  ;;  %v1883_v8 = vld.sshfl [vmem:[%s446_s7 + $0x3] sm:$0x1 pattern:$0x75316420]  ;;  %v929_v9 = vrot.slane %v1880_v4, %v2159_v33 }
  0x47   : > { %v677_v47 = vsel %vm676_vm5, %v675_v38, %v674_v42  ;;  %1943 = vmatprep.subr.bf16.mxu0 %v2052_v25  ;;  %v2275_v7 = vld [vmem:[#allocation2] sm:$0xff]  ;;  %v1029_v10 = vunpack.c.l.b16 %v943_v3  ;;  %v971_v13 = vrot.slane %v1883_v8, %v2159_v33  ;;  %vm1683_vm15 = vcmask 261248  }
  0x48   : > { %v680_v48 = vsel %vm679_vm6, %v678_v41, %v677_v47  ;;  %v1884_v12 = vld.sshfl [vmem:[%s446_s7 + $0x4] sm:$0x1 pattern:$0x75316420]  ;;  %v1030_v14 = vunpack.c.l.b16 %v957_v5  ;;  %v1028_v20 = vunpack.c.l.b16 %v929_v9 }
  0x49   : > { %v683_v51 = vsel %vm682_vm7, %v681_v43, %v680_v48  ;;  %v1885_v17 = vld.sshfl [vmem:[%s446_s7 + $0x5] sm:$0x1 pattern:$0x75316420]  ;;  %v985_v18 = vrot.slane %v1884_v12, %v2159_v33  ;;  %v1036_v21 = vrot.slane %v1029_v10, 7  ;;  %v1031_v27 = vunpack.c.l.b16 %v971_v13 }
  0x4a   : > { %v684_v53 = vpack.c.b16 %v683_v51, %v683_v51  ;;  %v1886_v23 = vld.sshfl [vmem:[%s446_s7 + $0x6] sm:$0x1 pattern:$0x75316420]  ;;  %v999_v26 = vrot.slane %v1885_v17, %v2159_v33  ;;  %v1038_v28 = vrot.slane %v1030_v14, 6 }
  0x4b   : > { %v1887_v30 = vld.sshfl [vmem:[%s446_s7 + $0x7] sm:$0x1 pattern:$0x75316420]  ;;  %v1013_v31 = vrot.slane %v1886_v23, %v2159_v33  ;;  %v1032_v34 = vunpack.c.l.b16 %v985_v18  ;;  %v1037_v35 = vsel %vm664_vm1, %v1036_v21, %v1028_v20  ;;  %v1040_v42 = vrot.slane %v1031_v27, 5 }
  0x4c   : > { %v1027_v38 = vrot.slane %v1887_v30, %v2159_v33  ;;  %v1033_v39 = vunpack.c.l.b16 %v999_v26  ;;  %v1039_v40 = vsel %vm667_vm2, %v1038_v28, %v1037_v35  ;;  %v1396_v23 = vrot.slane %v2167_v44, 1 }
  0x4d   : > { %1928 = vmatmul.mubr.msk.bf16.vlgmr.msra.gmra.mrb[0].mxu0 %vm828_vm8, %v684_v53  ;;  %v1034_v41 = vunpack.c.l.b16 %v1013_v31  ;;  %v1042_v43 = vrot.slane %v1032_v34, 4  ;;  %v1041_v51 = vsel %vm670_vm3, %v1040_v42, %v1039_v40  ;;  %v1623_v1 = vrot.slane %v1032_v34, 5 }
  0x4e   : > { %1945 = vmatprep.mubr.msk.bf16.mxu0 %vm2054_vm0, %v2052_v25  ;;  %v1035_v47 = vunpack.c.l.b16 %v1027_v38  ;;  %v1044_v48 = vrot.slane %v1033_v39, 3  ;;  %v1625_v4 = vrot.slane %v1033_v39, 4  ;;  %v1398_v26 = vrot.slane %v2171_v46, 7 }
  0x4f   : > { %v1046_v53 = vrot.slane %v1034_v41, 2  ;;  %v1043_v54 = vsel %vm673_vm4, %v1042_v43, %v1041_v51  ;;  %v1627_v9 = vrot.slane %v1034_v41, 3  ;;  %v1400_v28 = vrot.slane %v2174_v49, 6 }
  0x50   : > { %v1629_v13 = vrot.slane %v1035_v47, 2  ;;  %v1402_v31 = vrot.slane %v2176_v50, 5  ;;  %v1253_v35 = vrot.slane %v2204_v6, 1  ;;  %v1404_v38 = vrot.slane %v2179_v52, 4 }
  0x51   : > { %v1255_v46 = vrot.slane %v2215_v15, 7  ;;  %v1406_v49 = vrot.slane %v2187_v56, 3  ;;  %v1257_v42 = vrot.slane %v2220_v19, 6  ;;  %v1408_v52 = vrot.slane %v2193_v61, 2 }
  0x52   : > { %v1259_v15 = vrot.slane %v2226_v24, 5  ;;  %v1261_v56 = vrot.slane %v2231_v29, 4  ;;  %v1263_v19 = vrot.slane %v2235_v32, 3  ;;  %v1265_v61 = vrot.slane %v2239_v36, 2 }
 0x120   : > { %v869_v57 = vpop.f32.mrb[0].mxu0 }
 0x121   : > { %v2267_v58 = vadd.f32 %v2264_v55, %v869_v57  ;;  %v1929_v59 = vpop.f32.mrb[1].mxu0  ;;  %v1048_v57 = vrot.slane %v1035_v47, 1 }
 0x122   : > { %v872_v60 = vpop.f32.mrb[2].mxu0  ;;  %v1045_v59 = vsel %vm676_vm5, %v1044_v48, %v1043_v54 }
 0x123   : > { %v1930_v62 = vpop.f32.mrb[3].mxu0  ;;  %v877_v63 = vsel %vm876_vm10, %v2267_v58, -inf  ;;  %v1617_v60 = vrot.slane %v1028_v20, 1  ;;  %v1047_v33 = vsel %vm679_vm6, %v1046_v53, %v1045_v59 }
 0x124   : > { %878 = vmax.xlane.f32.xlu0 %v877_v63  ;;  %v1619_v62 = vrot.slane %v1030_v14, 7  ;;  %v1621_v63 = vrot.slane %v1031_v27, 6  ;;  %v1049_v2 = vsel %vm682_vm7, %v1048_v57, %v1047_v33  ;;  %v1397_v27 = vsel %vm664_vm1, %v2169_v45, %v1396_v23 }
 0x125   : > { %v1618_v3 = vsel %vm664_vm1, %v1029_v10, %v1617_v60  ;;  %v1050_v5 = vpack.c.b16 %v1049_v2, %v1049_v2  ;;  %v1399_v30 = vsel %vm667_vm2, %v1398_v26, %v1397_v27  ;;  %v1254_v45 = vsel %vm664_vm1, %v2210_v11, %v1253_v35  ;;  %v900_v27 = vld [vmem:[#allocation4] sm:$0xff] }
 0x126   : > { %v1620_v8 = vsel %vm667_vm2, %v1619_v62, %v1618_v3  ;;  %v1401_v34 = vsel %vm670_vm3, %v1400_v28, %v1399_v30  ;;  %v1256_v6 = vsel %vm667_vm2, %v1255_v46, %v1254_v45  ;;  %vm1711_vm1 = vcmask 257152  }
 0x127   : > { %v1622_v12 = vsel %vm670_vm3, %v1621_v63, %v1620_v8  ;;  %v1403_v44 = vsel %vm673_vm4, %v1402_v31, %v1401_v34 }
 0x128   : > { %v1624_v14 = vsel %vm673_vm4, %v1623_v1, %v1622_v12  ;;  %v1405_v50 = vsel %vm676_vm5, %v1404_v38, %v1403_v44 }
 0x129   : > { %v1626_v17 = vsel %vm676_vm5, %v1625_v4, %v1624_v14  ;;  %v1407_v43 = vsel %vm679_vm6, %v1406_v49, %v1405_v50 }
 0x12a   : > { %v1628_v18 = vsel %vm679_vm6, %v1627_v9, %v1626_v17  ;;  %v1409_v11 = vsel %vm682_vm7, %v1408_v52, %v1407_v43 }
 0x12b   : > { %v1630_v10 = vsel %vm682_vm7, %v1629_v13, %v1628_v18  ;;  %v1410_v48 = vpack.c.b16 %v1409_v11, %v1409_v11 }
 0x12c   : > { %v1631_v20 = vpack.c.b16 %v1630_v10, %v1630_v10 }
 0x12d   : > { %v1415_v57 = vsel %vm828_vm8, %v1410_v48, 0 }
 0x12e   : > { %v1636_v21 = vsel %vm1054_vm12, %v1631_v20, 0 }
 0x12f   : > { %1944 = vmatpush3.bf16.msra.mxu0 %v1636_v21 }
 0x1b1   : > { %v879_v16 = vpop.xlane.xlu0 %878 }
 0x1b2   : > { %v2281_v22 = vmax.f32 %v2275_v7, %v879_v16  ;;  %v1056_v16 = vsel %vm1054_vm12, %v1050_v5, 0  ;;  %v2057_v5 = vmov 1  }
 0x1b3   : > { %1932 = vmatpush3.bf16.msra.mxu1 %v1056_v16  ;;  %1998 = vset.pattern.permute.xlu1 %v2057_v5 }
 0x1b4   : > { %v881_v37 = vsub.f32 %v2275_v7, %v2281_v22  ;;  %1100 = vst.msk [vmem:[#allocation2] sm:$0xff] %vm898_vm11, %v2281_v22  ;;  %886 = vperm.xlu0 %1997, %v2281_v22   ;;  %1937 = vmatprep.subr.bf16.mxu1 %v2052_v25 }
 0x1bb   : > { %v1457_v9 = vld [vmem:[#allocation2] sm:$0xff] }
 0x233   : > { %v887_v39 = vpop.permute.xlu0 %886 }
 0x234   : > { %v889_v40 = vsub.f32 %v2267_v58, %v887_v39  ;;  %v1258_v58 = vsel %vm670_vm3, %v1257_v42, %v1256_v6 }
 0x235   : > { %v1260_v47 = vsel %vm673_vm4, %v1259_v15, %v1258_v58 }
 0x236   : > { %v890_v41 = vmul.f32 1.442695, %v889_v40  ;;  %v1262_v51 = vsel %vm676_vm5, %v1261_v56, %v1260_v47 }
 0x237   : > { %v1264_v24 = vsel %vm679_vm6, %v1263_v19, %v1262_v51 }
 0x238   : > { %2002 = vpow2.f32 %v890_v41  ;;  %v1266_v29 = vsel %vm682_vm7, %v1265_v61, %v1264_v24 }
 0x239   : > { %v1267_v59 = vpack.c.b16 %v1266_v29, %v1266_v29 }
 0x242   : > { %v2003_v53 = vpop.eup %2002 }
 0x243   : > { %v907_v54 = vpack.c.bf16 %v2003_v53, %v2003_v53  ;;  %v894_v13 = vsel %vm876_vm10, %v2003_v53, 0.0 }
 0x245   : > { %1934 = vmatmul.mubr.msk.bf16.vlgmr.msra.gmra.mrb[0].mxu1 %vm876_vm10, %v907_v54 }
 0x246   : > { %1938 = vmatpush3.bf16.xpose.msra.mxu1 %v1415_v57  ;;  %1939 = vmatprep.mubr.msk.bf16.mxu1 %vm2054_vm0, %v2052_v25  ;;  %vm1699_vm0 = vcmask 125952  }
 0x24d   : > { %1940 = vmatmul.mubr.msk.bf16.vlgmr.msra.gmra.mrb[4].mxu1 %vm828_vm8, %v1267_v59 }
 0x318   : > { %v1092_v32 = vpop.f32.mrb[0].mxu1 }
 0x319   : > { %v1935_v60 = vpop.f32.mrb[1].mxu1 }
 0x31a   : > { %v1095_v62 = vpop.f32.mrb[2].mxu1 }
 0x31b   : > { %v1936_v36 = vpop.f32.mrb[3].mxu1 }
 0x320   : > { %v1451_v63 = vpop.f32.mrb[4].mxu1 }
 0x321   : > { %v1452_v33 = vadd.f32 %v2264_v55, %v1451_v63  ;;  %v1941_v1 = vpop.f32.mrb[5].mxu1  ;;  %v882_v55 = vmul.f32 1.442695, %v881_v37  ;;  %v892_v37 = vld [vmem:[#allocation3] sm:$0xff] }
 0x322   : > { %v1454_v2 = vpop.f32.mrb[6].mxu1 }
 0x323   : > { %v1942_v3 = vpop.f32.mrb[7].mxu1  ;;  %v1458_v4 = vsel %vm876_vm10, %v1452_v33, -inf  ;;  %2004 = vpow2.f32 %v882_v55 }
 0x324   : > { %1459 = vmax.xlane.f32.xlu1 %v1458_v4 }
 0x32d   : > { %v2005_v17 = vpop.eup %2004 }
 0x32e   : > { %v893_v23 = vmul.f32 %v2005_v17, %v892_v37 }
 0x3b1   : > { %v1460_v8 = vpop.xlane.xlu1 %1459 }
 0x3b2   : > { %v1461_v12 = vmax.f32 %v1457_v9, %v1460_v8 }
 0x3b4   : > { %1685 = vst.msk [vmem:[#allocation2] sm:$0xff] %vm1479_vm13, %v1461_v12  ;;  %1467 = vperm.xlu1 %1998, %v1461_v12   ;;  %v1462_v16 = vsub.f32 %v1457_v9, %v1461_v12 }
 0x3b6   : > { %v1463_v14 = vmul.f32 1.442695, %v1462_v16 }
 0x3b8   : > { %1999 = vset.pattern.permute.xlu1 %v2056_v0  ;;  %2006 = vpow2.f32 %v1463_v14 }
 0x3c2   : > { %v2007_v18 = vpop.eup %2006 }
 0x3d8   : > { %895 = vadd.xlane.f32.xlu1 %v894_v13 }
 0x3e9   : > { %903 = vperm.xlu1 %1999, %v2005_v17  }
 0x3ed   : > { %2000 = vset.pattern.permute.xlu1 %v2057_v5 }
 0x3ee   : > { %1484 = vperm.xlu1 %2000, %v2007_v18  }
 0x433   : > { %v1468_v0 = vpop.permute.xlu1 %1467 }
 0x434   : > { %v1470_v10 = vsub.f32 %v1452_v33, %v1468_v0 }
 0x436   : > { %v1471_v20 = vmul.f32 1.442695, %v1470_v10 }
 0x438   : > { %2008 = vpow2.f32 %v1471_v20 }
 0x442   : > { %v2009_v21 = vpop.eup %2008 }
 0x443   : > { %v1475_v7 = vsel %vm876_vm10, %v2009_v21, 0.0  ;;  %v1488_v22 = vpack.c.bf16 %v2009_v21, %v2009_v21 }
 0x444   : > { %1476 = vadd.xlane.f32.xlu0 %v1475_v7 }
 0x445   : > { %1946 = vmatmul.mubr.msk.bf16.vlgmr.msra.gmra.mrb[4].mxu0 %vm876_vm10, %v1488_v22 }
 0x465   : > { %v896_v25 = vpop.xlane.xlu1 %895 }
 0x466   : > { %v897_v26 = vadd.f32 %v896_v25, %v893_v23 }
 0x468   : > { %899 = vst.msk [vmem:[#allocation3] sm:$0xff] %vm898_vm11, %v897_v26 }
 0x469   : > { %v904_v28 = vpop.permute.xlu1 %903 }
 0x46a   : > { %v906_v30 = vmul.f32 %v904_v28, %v900_v27 }
 0x46c   : > { %v1098_v31 = vadd.f32 %v1092_v32, %v906_v30 }
 0x46d   : > { %v1485_v42 = vpop.permute.xlu1 %1484 }
 0x46e   : > { %1099 = vst.msk [vmem:[#allocation4] sm:$0xff] %vm828_vm8, %v1098_v31 }
 0x46f   : > { %v1473_v34 = vld [vmem:[#allocation3] sm:$0xff] }
 0x470   : > { %v1474_v35 = vmul.f32 %v2007_v18, %v1473_v34 }
 0x475   : > { %v1481_v50 = vld [vmem:[#allocation4] sm:$0xff] }
 0x476   : > { %v1487_v6 = vmul.f32 %v1485_v42, %v1481_v50 }
 0x4d1   : > { %v1477_v38 = vpop.xlane.xlu0 %1476 }
 0x4d2   : > { %v1478_v39 = vadd.f32 %v1477_v38, %v1474_v35 }
 0x4d4   : > { %1480 = vst.msk [vmem:[#allocation3] sm:$0xff] %vm1479_vm13, %v1478_v39 }
 0x4db   : > { %v1689_v44 = vld [vmem:[#allocation3] sm:$0xff] }
 0x4dc   : > { %2010 = vrcp.f32 %v1689_v44 }
 0x4e6   : > { %v2011_v46 = vpop.eup %2010 }
 0x4e7   : > { %1694 = vperm.xlu0 %1997, %v2011_v46  }
 0x4eb   : > { %2001 = vset.pattern.permute.xlu0 %v2057_v5 }
 0x518   : > { %v1672_v40 = vpop.f32.mrb[4].mxu0 }
 0x519   : > { %1679 = vrot.lane.b32.xlu1 %v1672_v40, %s2058_s8  ;;  %v1947_v45 = vpop.f32.mrb[5].mxu0 }
 0x51a   : > { %v1675_v49 = vpop.f32.mrb[6].mxu0 }
 0x51b   : > { %v1948_v41 = vpop.f32.mrb[7].mxu0 }
 0x51d   : > { %1706 = vperm.xlu1 %2000, %v2011_v46  }
 0x566   : > { %v1695_v15 = vpop.permute.xlu0 %1694 }
 0x58b   : > { %v1680_v52 = vpop.permute.xlu1 %1679 }
 0x58c   : > { %v1682_v43 = vadd.f32 %v1680_v52, %v1487_v6 }
 0x58e   : > { %1684 = vst.msk [vmem:[#allocation4] sm:$0xff] %vm1683_vm15, %v1682_v43 }
 0x595   : > { %v1691_v58 = vld [vmem:[#allocation4] sm:$0xff] }
 0x596   : > { %v1697_v11 = vmul.f32 %v1695_v15, %v1691_v58 }
 0x598   : > { %v1698_v56 = vpack.c.bf16 %v1697_v11, %v1697_v11 }
 0x59a   : > { %1700 = vst.msk [vmem:[%s493_s12] sm:$0xf] %vm1699_vm0, %v1698_v56 }
 0x59c   : > { %v1707_v47 = vpop.permute.xlu1 %1706 }
 0x59d   : > { %v1709_v48 = vmul.f32 %v1707_v47, %v1691_v58 }
 0x59f   : > { %v1710_v19 = vpack.c.bf16 %v1709_v48, %v1709_v48 }
 0x5a1   : > { %1712 = vst.msk [vmem:[%s493_s12] sm:$0xf] %vm1711_vm1, %v1710_v19 }
 0x5a2 PF: > { %s14_s19 = sadd.s32 1, %s2050_s19   ;;  %s2383_s15 = smov %s2038_s16 }
 0x5a3   : > { %p11_p10 = scmp.ge.s32.totalorder %s14_s19, 4   ;;  %s2384_s16 = smov %s2123_s24 }
 0x5a4   : > { %s2385_s17 = smov %s2046_s18  ;;  %s2386_s18 = smov %s2388_s20 }
 0x5a5   :  { %13 = sbr.rel (!%p11_p10) target bundleno = 3 (0x3), region = 221 }

// kernel: custom_labse_forward.15
= control target key start
LH: loop header
LB: loop body
LE: loop exit
PB: predicated region body
PF: predicated region fallthrough
CT: control target
= control target key end

     0   :  { %s499_s12 = smov 0   ;;  %s501_s13 = smov 0   ;;  %s541_s0 = inlined_call_operand.vmem [shape: bf16[16,32], index: 0, kind: input, shape index: {}]   ;;  %s542_s1 = inlined_call_operand.vmem [shape: bf16[32,64], index: 1, kind: input, shape index: {}]   ;;  %s543_s2 = inlined_call_operand.vmem [shape: f32[1,64], index: 2, kind: input, shape index: {}]   ;;  %s544_s3 = inlined_call_operand.vmem [shape: bf16[16,64], index: 3, kind: output, shape index: {}]  }
   0x1   :  { %s503_s14 = smov 0  }
   0x2 LB: > { %s22_s15 = sadd.s32 1, %s471_s13  ;;  %p403_p0 = scmp.ge.s32.totalorder %s475_s14, 1  ;;  %s475_s14 = sphi %s503_s14, %s13_s14   ;;  %s471_s13 = sphi %s501_s13, %s546_s13   ;;  %s467_s12 = sphi %s499_s12, %s545_s12  }
   0x3   : > { %p23_p1 = scmp.ge.s32.totalorder %s22_s15, 2  ;;  %p167_p2 = scmp.lt.s32.totalorder %s475_s14, 3 }
   0x5   : > { %s548_s15 = smov (%p23_p1, %s22_s15), 0  ;;  %p168_p3 = pnand %p403_p0, %p167_p2 }
   0x6   : > { %v449_v0 = vld [vmem:[%s542_s1] sm:$0xff] (!%p168_p3)   ;;  %v477_v1 = vmov (!%p168_p3), 0.0   ;;  %v450_v2 = vld [vmem:[%s542_s1 + $0x8] sm:$0xff] (!%p168_p3)   ;;  %vm478_vm0 = vmmov (!%p168_p3), 0   ;;  %p199_p4 = scmp.lt.s32.totalorder (!%p168_p3), %s467_s12, 1  ;;  %vm242_vm1 = vcmask (!%p168_p3), 261120  }
   0x7   : > { %171 = sbr.rel (%p168_p3) target bundleno = 262 (0x106), region = 32  ;;  %415 = vmatprep.subr.bf16.mxu0 (!%p168_p3), %v477_v1  ;;  %419 = vmatprep.mubr.msk.bf16.mxu0 (!%p168_p3), %vm478_vm0, %v477_v1  ;;  %v406_v4 = vld [vmem:[%s543_s2] ss:$0 sm:$0xff] (!%p168_p3)  ;;  %vm296_vm2 = vcmask (!%p168_p3), 519168  }
   0x8   : > { %416 = vmatpush3.bf16.msra.mxu0 (!%p168_p3), %v449_v0 }
   0x9   : > { %417 = vmatprep.subr.bf16.mxu0 (!%p168_p3), %v477_v1 }
   0xc   : > { %418 = vmatpush3.bf16.msra.mxu0 (!%p168_p3), %v450_v2 }
   0xe   : > { %s550_s12 = smov (!%p199_p4, %s467_s12), 1 }
   0xf   : > { %s404_s20 = sshll.u32 %s550_s12, 2 }
  0x10   : > { %s202_s23 = scalar_lea.vmem %s541_s0, %s404_s20  ;;  %s216_s28 = scalar_lea.vmem %s544_s3, %s404_s20 }
  0x11   : > { %v218_v3 = vld [vmem:[%s202_s23] sm:$0xf] }
  0x12   : > { %420 = vmatmul.mubr.msk.bf16.vlgmr.msra.gmra.mrb[0].mxu0 %vm242_vm1, %v218_v3 }
  0xe5   : > { %v280_v5 = vpop.f32.mrb[0].mxu0 }
  0xe6   : > { %v281_v6 = vadd.f32 %v406_v4, %v280_v5  ;;  %v421_v7 = vpop.f32.mrb[1].mxu0 }
  0xe7   : > { %v283_v8 = vpop.f32.mrb[2].mxu0 }
  0xe8   : > { %v286_v9 = vmul.f32 %v281_v6, %v281_v6  ;;  %v422_v10 = vpop.f32.mrb[3].mxu0 }
  0xea   : > { %v287_v11 = vmul.f32 %v286_v9, %v281_v6 }
  0xec   : > { %v288_v12 = vmul.f32 0.044715, %v287_v11 }
  0xee   : > { %v289_v13 = vadd.f32 %v288_v12, %v281_v6 }
  0xf0   : > { %v290_v14 = vmul.f32 0.7978846, %v289_v13 }
  0xf2   : > { %451 = vtanh.f32 %v290_v14 }
  0xfc   : > { %v452_v15 = vpop.eup %451 }
  0xfd   : > { %v292_v16 = vadd.f32 1.0, %v452_v15 }
  0xff   : > { %v293_v17 = vmul.f32 0.5, %v292_v16 }
 0x101   : > { %v294_v18 = vmul.f32 %v293_v17, %v281_v6 }
 0x103   : > { %v295_v19 = vpack.c.bf16 %v294_v18, %v294_v18 }
 0x105   : > { %297 = vst.msk [vmem:[%s216_s28] sm:$0xf] %vm296_vm2, %v295_v19 }
 0x106 PF: > { %s13_s14 = sadd.s32 1, %s475_s14   ;;  %s545_s12 = smov %s471_s13 }
 0x107   : > { %p10_p5 = scmp.ge.s32.totalorder %s13_s14, 4   ;;  %s546_s13 = smov %s548_s15 }
 0x109   :  { %12 = sbr.rel (!%p10_p5) target bundleno = 2 (0x2), region = 68 }

// kernel: custom_labse_forward.16
= control target key start
LH: loop header
LB: loop body
LE: loop exit
PB: predicated region body
PF: predicated region fallthrough
CT: control target
= control target key end

     0   :  { %s547_s21 = smov 0   ;;  %s593_s0 = inlined_call_operand.vmem [shape: bf16[16,64], index: 0, kind: input, shape index: {}]   ;;  %s594_s1 = inlined_call_operand.vmem [shape: bf16[64,32], index: 1, kind: input, shape index: {}]   ;;  %s595_s2 = inlined_call_operand.vmem [shape: f32[1,32], index: 2, kind: input, shape index: {}]   ;;  %s596_s3 = inlined_call_operand.vmem [shape: bf16[16,32], index: 3, kind: input, shape index: {}]   ;;  %s597_s4 = inlined_call_operand.vmem [shape: f32[1,32], index: 4, kind: input, shape index: {}]   ;;  %s598_s5 = inlined_call_operand.vmem [shape: f32[1,32], index: 5, kind: input, shape index: {}]   ;;  %s599_s6 = inlined_call_operand.vmem [shape: bf16[16,32], index: 6, kind: output, shape index: {}]  }
   0x1 LB: > { %s451_s22 = sadd.s32 4294967295, %s508_s21   ;;  %p455_p0 = scmp.ge.s32.totalorder %s508_s21, 1  ;;  %s508_s21 = sphi %s547_s21, %s16_s21  }
   0x2   : > { %p220_p1 = scmp.lt.s32.totalorder %s508_s21, 3 }
   0x4   : > { %p221_p2 = pnand %p455_p0, %p220_p1 }
   0x5   : > { %v496_v0 = vld [vmem:[%s594_s1] sm:$0xff] (!%p221_p2)   ;;  %v510_v1 = vmov (!%p221_p2), 0.0   ;;  %v497_v2 = vld [vmem:[%s594_s1 + $0x8] sm:$0xff] (!%p221_p2)   ;;  %vm511_vm0 = vmmov (!%p221_p2), 0   ;;  %p252_p3 = scmp.lt.s32.totalorder (!%p221_p2), %s451_s22, 1  ;;  %v498_v3 = vld [vmem:[%s594_s1 + $0x10] sm:$0xff] (!%p221_p2)  }
   0x6   : > { %224 = sbr.rel (%p221_p2) target bundleno = 554 (0x22a), region = 44  ;;  %474 = vmatprep.subr.bf16.mxu0 (!%p221_p2), %v510_v1  ;;  %482 = vmatprep.mubr.msk.bf16.mxu0 (!%p221_p2), %vm511_vm0, %v510_v1  ;;  %v499_v4 = vld [vmem:[%s594_s1 + $0x18] sm:$0xff] (!%p221_p2)   ;;  %vm305_vm1 = vcmask (!%p221_p2), 523264   ;;  %v459_v7 = vld [vmem:[%s595_s2] ss:$0 sm:$0xff] (!%p221_p2)  ;;  %vm352_vm2 = vcmask (!%p221_p2), 261120  }
   0x7   : > { %475 = vmatpush3.bf16.msra.mxu0 (!%p221_p2), %v496_v0  ;;  %v465_v25 = vld [vmem:[%s597_s4] ss:$0 sm:$0xff] (!%p221_p2)  ;;  %vm384_vm3 = vcmask (!%p221_p2), 257024  }
   0x8   : > { %476 = vmatprep.subr.bf16.mxu0 (!%p221_p2), %v510_v1  ;;  %v466_v27 = vld [vmem:[%s598_s5] ss:$0 sm:$0xff] (!%p221_p2) }
   0xb   : > { %477 = vmatpush3.bf16.msra.mxu0 (!%p221_p2), %v497_v2 }
   0xc   : > { %478 = vmatprep.subr.bf16.mxu0 (!%p221_p2), %v510_v1 }
   0xd   : > { %s601_s22 = smov (!%p252_p3, %s451_s22), 1 }
   0xe   : > { %s564_s29 = sshll.u32 %s601_s22, 2 }
   0xf   : > { %479 = vmatpush3.bf16.msra.mxu0 %v498_v3  ;;  %s255_s10 = scalar_lea.vmem %s593_s0, %s564_s29  ;;  %s259_s13 = scalar_lea.vmem %s596_s3, %s564_s29 }
  0x10   : > { %480 = vmatprep.subr.bf16.mxu0 %v510_v1  ;;  %v265_v5 = vld [vmem:[%s255_s10] sm:$0xf]  ;;  %s263_s23 = scalar_lea.vmem %s599_s6, %s564_s29 }
  0x11   : > { %v349_v6 = vld [vmem:[%s259_s13] sm:$0xf] }
  0x12   : > { %v350_v8 = vunpack.c.l.bf16 %v349_v6 }
  0x13   : > { %481 = vmatpush3.bf16.msra.mxu0 %v499_v4 }
  0x16   : > { %483 = vmatmul.mubr.msk.bf16.vlgmr.msra.gmra.mrb[0].mxu0 %vm305_vm1, %v265_v5 }
  0xe9   : > { %v343_v9 = vpop.f32.mrb[0].mxu0 }
  0xea   : > { %v344_v10 = vadd.f32 %v459_v7, %v343_v9  ;;  %v484_v11 = vpop.f32.mrb[1].mxu0 }
  0xeb   : > { %v346_v12 = vpop.f32.mrb[2].mxu0 }
  0xec   : > { %v485_v13 = vpop.f32.mrb[3].mxu0  ;;  %v351_v14 = vadd.f32 %v350_v8, %v344_v10 }
  0xee   : > { %v353_v15 = vsel %vm352_vm2, %v351_v14, 0.0 }
  0xef   : > { %354 = vadd.xlane.f32.xlu0 %v353_v15 }
 0x17c   : > { %v355_v16 = vpop.xlane.xlu0 %354 }
 0x17d   : > { %v357_v17 = vmul.f32 0.03125, %v355_v16 }
 0x17f   : > { %v358_v18 = vsub.f32 %v351_v14, %v357_v17 }
 0x181   : > { %v359_v19 = vmul.f32 %v358_v18, %v358_v18 }
 0x183   : > { %v360_v20 = vsel %vm352_vm2, %v359_v19, 0.0 }
 0x184   : > { %361 = vadd.xlane.f32.xlu0 %v360_v20 }
 0x211   : > { %v362_v21 = vpop.xlane.xlu0 %361 }
 0x212   : > { %v363_v22 = vmul.f32 0.03125, %v362_v21 }
 0x214   : > { %v364_v23 = vadd.f32 1e-12, %v363_v22 }
 0x216   : > { %500 = vrsqrt.f32 %v364_v23 }
 0x220   : > { %v501_v24 = vpop.eup %500 }
 0x221   : > { %v366_v26 = vmul.f32 %v501_v24, %v358_v18 }
 0x223   : > { %v374_v28 = vmul.f32 %v465_v25, %v366_v26 }
 0x225   : > { %v382_v29 = vadd.f32 %v466_v27, %v374_v28 }
 0x227   : > { %v383_v30 = vpack.c.bf16 %v382_v29, %v382_v29 }
 0x229   : > { %385 = vst.msk [vmem:[%s263_s23] sm:$0xf] %vm384_vm3, %v383_v30 }
 0x22a PF: > { %s16_s21 = sadd.s32 1, %s508_s21  }
 0x22b   : > { %p13_p4 = scmp.ge.s32.totalorder %s16_s21, 4  }
 0x22d   :  { %15 = sbr.rel (!%p13_p4) target bundleno = 1 (0x1), region = 77 }

</bundles_post_ra>
